<compile_context>
chip_gen: v7x
topology: tpu7x:2x2x1
jax: 0.10.0
libtpu: 0.0.40
codegen_flags: <defaults>
</compile_context>

<pallas_src>
import math

import jax
import jax.numpy as jnp
from jax import lax
from jax.experimental import pallas as pl
from jax.experimental.pallas import tpu as pltpu

# ----- module hyperparameters -------------------------------------------------
NULL = 0
BYTE_VOCAB_DIM = 257
BYTE_EMBED_DIM = 32
PACKET_REP_DIM = 64                      # biLSTM hidden = PACKET_REP_DIM // 2 per dir
PACKET_ENC_LAYERS = 1
PACKET_ENC_DROPOUT = 0.0                 # eval mode: dropout == identity
METADATA_MLP_DROPOUT = 0.0
PACKET_COMBINER_DROPOUT = 0.0
HIDDEN = PACKET_REP_DIM // 2             # 32 per direction


# ============================ fused Pallas kernel =============================

def _packet_encoder_kernel(tmax_ref, len_ref, x_ref, cat_ref, num_ref,
                           wih_f_ref, bf_ref, whh_f_ref, wih_b_ref, bb_ref,
                           w1c_ref, w1n_ref, b1_ref,
                           w2f_ref, w2b_ref, w2m_ref, b2_ref,
                           out_ref, gx_ref):
    """Fused biLSTM(last-step) + metadata MLP + packet combiner.

    tmax_ref : SMEM (1,) int32    -- max(lengths), clamped >= 1
    len_ref  : VMEM [B, 1] int32  -- per-sequence valid length
    x_ref    : VMEM [T*B, E]      -- time-major flattened byte embeddings
    cat_ref  : VMEM [B, CAT], num_ref: VMEM [B, NUM]
    wih_f/bf : [E, 4H] / [1, 4H]  forward input weights/bias, gate order (i,f,o,g)
    whh_f    : [H, 4H]            forward hidden weights
    wih_b/bb : [E, 4H] / [1, 4H]  backward input weights/bias (only step t_max-1 needed)
    w1c/w1n/b1 : metadata MLP (split over the cat|num concat)
    w2f/w2b/w2m/b2 : packet combiner (split over content_f|content_b|meta concat)
    out_ref  : [B, PACKET_REP_DIM]
    gx_ref   : VMEM scratch [T*B, 4H] -- hoisted forward input projections
    """
    B = len_ref.shape[0]
    T = gx_ref.shape[0] // B
    H = whh_f_ref.shape[0]

    # --- hoisted FORWARD projection: one [T*B, E] @ [E, 4H] matmul, bias folded,
    #     stored with a single vst (no gx_all live range, no static scatter loop).
    gx_ref[...] = (jnp.dot(x_ref[...], wih_f_ref[...],
                           preferred_element_type=jnp.float32) + bf_ref[...])

    t_max = tmax_ref[0]
    t_last = t_max - 1
    lens = len_ref[...]                                        # [B, 1] int32

    def half_cell(g, c_prev):
        # gate column order (permuted at init): [i, f, o, g]
        sig = jax.nn.sigmoid(g[:, :3 * H])                     # one EUP slab
        i_g = sig[:, 0 * H:1 * H]
        f_g = sig[:, 1 * H:2 * H]
        o_g = sig[:, 2 * H:3 * H]
        g_g = jnp.tanh(g[:, 3 * H:4 * H])
        c_new = f_g * c_prev + i_g * g_g
        h_new = o_g * jnp.tanh(c_new)
        return h_new, c_new

    zeros_bh = jnp.zeros((B, H), jnp.float32)

    # --- forward recurrence: register carries, static trip count T, fully
    #     unrolled; h at the (dynamic) consumed step t_max-1 captured via where.
    def fwd_step(t, carry):
        h, c, h_out = carry
        off = pl.multiple_of(t * B, 8)
        g = (gx_ref[pl.ds(off, B), :]
             + jnp.dot(h, whh_f_ref[...], preferred_element_type=jnp.float32))
        h_new, c_new = half_cell(g, c)
        h_out = jnp.where(t == t_last, h_new, h_out)
        return h_new, c_new, h_out

    _, _, h_f = lax.fori_loop(0, T, fwd_step, (zeros_bh, zeros_bh, zeros_bh),
                              unroll=True)

    # --- backward direction ---------------------------------------------------
    # Only lstm_output[:, t_max-1, :] is consumed; for the backward direction
    # that step is its FIRST step from a zero initial state, so it equals one
    # LSTM cell on x[t_max-1] (the h @ W_hh_b term vanishes).
    off_last = pl.multiple_of(t_last * B, 8)
    x_last = x_ref[pl.ds(off_last, B), :]
    g_b = (jnp.dot(x_last, wih_b_ref[...], preferred_element_type=jnp.float32)
           + bb_ref[...])
    h_b, _ = half_cell(g_b, zeros_bh)

    # pack/pad masking: only sequences with length == t_max are valid at t_max-1.
    valid = (lens > t_last).astype(jnp.float32)                # [B, 1]
    content_f = h_f * valid
    content_b = h_b * valid

    # --- metadata MLP + packet combiner (split matmuls, no concat) ------------
    m = jnp.maximum(
        jnp.dot(cat_ref[...], w1c_ref[...], preferred_element_type=jnp.float32)
        + jnp.dot(num_ref[...], w1n_ref[...], preferred_element_type=jnp.float32)
        + b1_ref[...], 0.0)
    y = (jnp.dot(content_f, w2f_ref[...], preferred_element_type=jnp.float32)
         + jnp.dot(content_b, w2b_ref[...], preferred_element_type=jnp.float32)
         + jnp.dot(m, w2m_ref[...], preferred_element_type=jnp.float32)
         + b2_ref[...])
    out_ref[...] = jnp.maximum(y, 0.0)


# ============================ wrapper =========================================

_SMEM_SPEC = pl.BlockSpec(memory_space=pltpu.MemorySpace.SMEM)
_VMEM_SPEC = pl.BlockSpec(memory_space=pltpu.MemorySpace.VMEM)


def packet_encoder_forward(kp, byte_sequence, categorical_features,
                           numerical_features):
    B, T = byte_sequence.shape
    E, H = BYTE_EMBED_DIM, HIDDEN

    # embedding lookups (gather glue in plain JAX)
    cat_embeds = jnp.concatenate(
        [kp["cat_emb"][i][categorical_features[:, i]]
         for i in range(len(kp["cat_emb"]))], axis=-1)
    byte_embeds = kp["byte_emb"][byte_sequence].astype(jnp.float32)    # [B, T, E]

    lengths = jnp.sum((byte_sequence == NULL).astype(jnp.int32), axis=1)   # [B]
    # clamp: guards length-0 corner (PyTorch pack_padded_sequence would reject)
    t_max = jnp.maximum(jnp.max(lengths), 1).astype(jnp.int32).reshape(1)

    # pad batch to the f32 sublane multiple (8): dense, aligned [B, *] tiles.
    B_pad = max(8, ((B + 7) // 8) * 8)
    pad = B_pad - B
    x_tbe = jnp.transpose(byte_embeds, (1, 0, 2))                      # [T, B, E]
    x_tbe = jnp.pad(x_tbe, ((0, 0), (0, pad), (0, 0)))
    x_flat = x_tbe.reshape(T * B_pad, E)                               # time-major flat
    lens_p = jnp.pad(lengths, (0, pad)).reshape(B_pad, 1)
    cat_p = jnp.pad(cat_embeds.astype(jnp.float32), ((0, pad), (0, 0)))
    num_p = jnp.pad(numerical_features.astype(jnp.float32), ((0, pad), (0, 0)))

    out = pl.pallas_call(
        _packet_encoder_kernel,
        out_shape=jax.ShapeDtypeStruct((B_pad, PACKET_REP_DIM), jnp.float32),
        in_specs=[_SMEM_SPEC] + [_VMEM_SPEC] * 16,
        out_specs=_VMEM_SPEC,
        scratch_shapes=[pltpu.VMEM((T * B_pad, 4 * H), jnp.float32)],
    )(t_max, lens_p, x_flat, cat_p, num_p,
      kp["wih_f"], kp["b_f"], kp["whh_f"], kp["wih_b"], kp["b_b"],
      kp["w1c"], kp["w1n"], kp["b1"],
      kp["w2f"], kp["w2b"], kp["w2m"], kp["b2"])
    return out[:B]


# ============================ parameters ======================================

def init_params(key, categorical_dims, numerical_dim):
    """PyTorch-layout parameters (also used by the pure-JAX reference)."""
    H, E = HIDDEN, BYTE_EMBED_DIM
    keys = jax.random.split(key, 32)

    def unif(k, shape, bound):
        return jax.random.uniform(k, shape, jnp.float32, -bound, bound)

    p = {}
    p["byte_emb"] = jax.random.normal(keys[0], (BYTE_VOCAB_DIM, E), jnp.float32)
    p["cat_emb"] = [jax.random.normal(keys[1 + i], (d, max(50, d // 2)), jnp.float32)
                    for i, d in enumerate(categorical_dims)]
    ko = 1 + len(categorical_dims)

    kl = 1.0 / math.sqrt(H)
    # LSTM weights in PyTorch layout: W_ih [4H, E], W_hh [4H, H], gate rows (i, f, g, o)
    p["wih_f"] = unif(keys[ko + 0], (4 * H, E), kl)
    p["whh_f"] = unif(keys[ko + 1], (4 * H, H), kl)
    p["bih_f"] = unif(keys[ko + 2], (4 * H,), kl)
    p["bhh_f"] = unif(keys[ko + 3], (4 * H,), kl)
    p["wih_b"] = unif(keys[ko + 4], (4 * H, E), kl)
    p["whh_b"] = unif(keys[ko + 5], (4 * H, H), kl)
    p["bih_b"] = unif(keys[ko + 6], (4 * H,), kl)
    p["bhh_b"] = unif(keys[ko + 7], (4 * H,), kl)

    cat_embed_dim = sum(max(50, d // 2) for d in categorical_dims)
    meta_in = cat_embed_dim + numerical_dim
    k1 = 1.0 / math.sqrt(meta_in)
    p["w1"] = unif(keys[ko + 8], (PACKET_REP_DIM // 4, meta_in), k1)   # Linear [out, in]
    p["b1"] = unif(keys[ko + 9], (PACKET_REP_DIM // 4,), k1)
    comb_in = PACKET_REP_DIM + PACKET_REP_DIM // 4
    k2 = 1.0 / math.sqrt(comb_in)
    p["w2"] = unif(keys[ko + 10], (PACKET_REP_DIM, comb_in), k2)
    p["b2"] = unif(keys[ko + 11], (PACKET_REP_DIM,), k2)
    return p


def pack_kernel_params(p, categorical_dims, numerical_dim):
    """Build kernel operands: gate-permuted (i,f,o,g), transposed, fwd/bwd split."""
    H = HIDDEN
    cat_embed_dim = sum(max(50, d // 2) for d in categorical_dims)

    def perm(w):      # gate rows (i, f, g, o) -> (i, f, o, g), along axis 0
        return jnp.concatenate([w[:2 * H], w[3 * H:4 * H], w[2 * H:3 * H]], axis=0)

    kp = {"byte_emb": p["byte_emb"], "cat_emb": p["cat_emb"]}
    kp["wih_f"] = perm(p["wih_f"]).T                                               # [E, 4H]
    kp["b_f"] = perm(p["bih_f"] + p["bhh_f"]).reshape(1, 4 * H)                    # [1, 4H]
    kp["whh_f"] = perm(p["whh_f"]).T                                               # [H, 4H]
    kp["wih_b"] = perm(p["wih_b"]).T                                               # [E, 4H]
    kp["b_b"] = perm(p["bih_b"] + p["bhh_b"]).reshape(1, 4 * H)                    # [1, 4H]
    # note: whh_b is mathematically unused (backward output at t_max-1 has zero h)

    kp["w1c"] = p["w1"][:, :cat_embed_dim].T                                       # [CAT, 16]
    kp["w1n"] = p["w1"][:, cat_embed_dim:].T                                       # [NUM, 16]
    kp["b1"] = p["b1"].reshape(1, -1)
    kp["w2f"] = p["w2"][:, 0:H].T                                                  # [H, 64]
    kp["w2b"] = p["w2"][:, H:2 * H].T                                              # [H, 64]
    kp["w2m"] = p["w2"][:, 2 * H:].T                                               # [16, 64]
    kp["b2"] = p["b2"].reshape(1, -1)
    return kp


# ============================ pure-JAX reference ==============================

def packet_encoder_reference(p, byte_sequence, categorical_features,
                             numerical_features):
    """Straightforward (full bidirectional, per-step) re-implementation."""
    B, T = byte_sequence.shape
    H = HIDDEN
    hp = jax.lax.Precision.HIGHEST

    cat_embeds = jnp.concatenate(
        [p["cat_emb"][i][categorical_features[:, i]]
         for i in range(len(p["cat_emb"]))], axis=-1)
    byte_embeds = p["byte_emb"][byte_sequence].astype(jnp.float32)
    lengths = jnp.sum((byte_sequence == NULL).astype(jnp.int32), axis=1)
    lens2 = lengths[:, None]

    def cell(x_t, h, c, wih, whh, bih, bhh):
        g = (jnp.dot(x_t, wih.T, precision=hp) + jnp.dot(h, whh.T, precision=hp)
             + bih + bhh)
        i = jax.nn.sigmoid(g[:, 0:H]); f = jax.nn.sigmoid(g[:, H:2 * H])
        gg = jnp.tanh(g[:, 2 * H:3 * H]); o = jax.nn.sigmoid(g[:, 3 * H:4 * H])
        c_new = f * c + i * gg
        return o * jnp.tanh(c_new), c_new

    h = c = jnp.zeros((B, H), jnp.float32)
    outs_f = []
    for t in range(T):
        h, c = cell(byte_embeds[:, t], h, c, p["wih_f"], p["whh_f"],
                    p["bih_f"], p["bhh_f"])
        outs_f.append(jnp.where(lens2 > t, h, 0.0))
    h = c = jnp.zeros((B, H), jnp.float32)
    outs_b = [None] * T
    for t in range(T - 1, -1, -1):
        h_new, c_new = cell(byte_embeds[:, t], h, c, p["wih_b"], p["whh_b"],
                            p["bih_b"], p["bhh_b"])
        valid = lens2 > t
        h = jnp.where(valid, h_new, h)
        c = jnp.where(valid, c_new, c)
        outs_b[t] = jnp.where(valid, h, 0.0)

    lstm_out = jnp.concatenate([jnp.stack(outs_f, 1), jnp.stack(outs_b, 1)], -1)
    t_max = int(jnp.maximum(jnp.max(lengths), 1))
    content = lstm_out[:, t_max - 1, :]                      # pad_packed -> [:, -1, :]

    meta = jnp.concatenate([cat_embeds, numerical_features.astype(jnp.float32)], -1)
    m = jax.nn.relu(jnp.dot(meta, p["w1"].T, precision=hp) + p["b1"])
    y = jnp.dot(jnp.concatenate([content, m], -1), p["w2"].T, precision=hp) + p["b2"]
    return jax.nn.relu(y)


# ============================ main ============================================

if __name__ == "__main__":
    key = jax.random.PRNGKey(0)
    categorical_dims = [16, 32]
    numerical_dim = 4
    B, T = 4, 16

    k_params, k_bytes, k_cat, k_num = jax.random.split(key, 4)
    params = init_params(k_params, categorical_dims, numerical_dim)
    kparams = pack_kernel_params(params, categorical_dims, numerical_dim)

    byte_sequence = jax.random.randint(k_bytes, (B, T), 0, BYTE_VOCAB_DIM,
                                       dtype=jnp.int32)
    byte_sequence = byte_sequence.at[:, 0].set(NULL)   # every row: length >= 1
    byte_sequence = byte_sequence.at[0, :].set(NULL)   # row 0: length == T == max(lengths)

    categorical_features = jnp.stack(
        [jax.random.randint(jax.random.fold_in(k_cat, i), (B,), 0, d, dtype=jnp.int32)
         for i, d in enumerate(categorical_dims)], axis=1)
    numerical_features = jax.random.normal(k_num, (B, numerical_dim),
                                           dtype=jnp.float32)

    fwd = jax.jit(packet_encoder_forward)
    out = jax.block_until_ready(
        fwd(kparams, byte_sequence, categorical_features, numerical_features))

    assert out.shape == (B, PACKET_REP_DIM), out.shape
    assert bool(jnp.all(jnp.isfinite(out)))

    ref = packet_encoder_reference(params, byte_sequence, categorical_features,
                                   numerical_features)
    max_err = float(jnp.max(jnp.abs(out - ref)))
    # in-kernel dots use default MXU precision vs. HIGHEST in the reference
    assert jnp.allclose(out, ref, rtol=2e-3, atol=2e-3), f"max abs err {max_err}"

    print("KERNEL_OK")
</pallas_src>

<mosaic_0001>
module attributes {stable_mosaic.version = 11 : i64} {
  func.func @_packet_encoder_kernel(%arg0: memref<1xi32, #tpu.memory_space<smem>>, %arg1: memref<8x1xi32, #tpu.memory_space<vmem>>, %arg2: memref<128x32xf32, #tpu.memory_space<vmem>>, %arg3: memref<8x100xf32, #tpu.memory_space<vmem>>, %arg4: memref<8x4xf32, #tpu.memory_space<vmem>>, %arg5: memref<32x128xf32, #tpu.memory_space<vmem>>, %arg6: memref<1x128xf32, #tpu.memory_space<vmem>>, %arg7: memref<32x128xf32, #tpu.memory_space<vmem>>, %arg8: memref<32x128xf32, #tpu.memory_space<vmem>>, %arg9: memref<1x128xf32, #tpu.memory_space<vmem>>, %arg10: memref<100x16xf32, #tpu.memory_space<vmem>>, %arg11: memref<4x16xf32, #tpu.memory_space<vmem>>, %arg12: memref<1x16xf32, #tpu.memory_space<vmem>>, %arg13: memref<32x64xf32, #tpu.memory_space<vmem>>, %arg14: memref<32x64xf32, #tpu.memory_space<vmem>>, %arg15: memref<16x64xf32, #tpu.memory_space<vmem>>, %arg16: memref<1x64xf32, #tpu.memory_space<vmem>>, %arg17: memref<8x64xf32, #tpu.memory_space<vmem>>, %arg18: memref<128x128xf32, #tpu.memory_space<vmem>>) attributes {dimension_semantics = [], scalar_prefetch = 0 : i64, scratch_operands = 1 : i64, tpu.core_type = #tpu.core_type<tc>} {
    %c0 = arith.constant 0 : index
    %c0_0 = arith.constant 0 : index
    %0 = vector.load %arg2[%c0, %c0_0] : memref<128x32xf32, #tpu.memory_space<vmem>>, vector<128x32xf32>
    %c0_1 = arith.constant 0 : index
    %c0_2 = arith.constant 0 : index
    %1 = vector.load %arg5[%c0_1, %c0_2] : memref<32x128xf32, #tpu.memory_space<vmem>>, vector<32x128xf32>
    %cst = arith.constant dense<0.000000e+00> : vector<128x128xf32>
    %2 = tpu.matmul %0, %1, %cst {dimension_numbers = #tpu.dot_dimension_numbers<[1], [0], [0], [1], [0, 0, 1, 1], [], []>} : vector<128x32xf32>, vector<32x128xf32>, vector<128x128xf32> -> vector<128x128xf32>
    %c0_3 = arith.constant 0 : index
    %c0_4 = arith.constant 0 : index
    %3 = vector.load %arg6[%c0_3, %c0_4] : memref<1x128xf32, #tpu.memory_space<vmem>>, vector<1x128xf32>
    %4 = vector.broadcast %3 : vector<1x128xf32> to vector<128x128xf32>
    %5 = arith.addf %2, %4 : vector<128x128xf32>
    %c0_5 = arith.constant 0 : index
    %c0_6 = arith.constant 0 : index
    %6 = vector.load %arg18[%c0_5, %c0_6] : memref<128x128xf32, #tpu.memory_space<vmem>>, vector<128x128xf32>
    tpu.vector_store %arg18[%c0_5, %c0_6], %5 {strides = array<i32>} : memref<128x128xf32, #tpu.memory_space<vmem>>, vector<128x128xf32>,
    %c0_7 = arith.constant 0 : index
    %7 = memref.load %arg0[%c0_7] : memref<1xi32, #tpu.memory_space<smem>>
    %c1_i32 = arith.constant 1 : i32
    %8 = arith.subi %7, %c1_i32 : i32
    %c0_8 = arith.constant 0 : index
    %c0_9 = arith.constant 0 : index
    %9 = vector.load %arg1[%c0_8, %c0_9] : memref<8x1xi32, #tpu.memory_space<vmem>>, vector<8x1xi32>
    %cst_10 = arith.constant 0.000000e+00 : f32
    %10 = vector.broadcast %cst_10 : f32 to vector<8x32xf32>
    %c0_i32 = arith.constant 0 : i32
    %c8_i32 = arith.constant 8 : i32
    %11 = arith.muli %c0_i32, %c8_i32 : i32
    %12 = tpu.assume_multiple %11, 8 : i32
    %13 = arith.index_cast %12 : i32 to index
    %c0_11 = arith.constant 0 : index
    %14 = vector.load %arg18[%13, %c0_11] : memref<128x128xf32, #tpu.memory_space<vmem>>, vector<8x128xf32>
    %c0_12 = arith.constant 0 : index
    %c0_13 = arith.constant 0 : index
    %15 = vector.load %arg7[%c0_12, %c0_13] : memref<32x128xf32, #tpu.memory_space<vmem>>, vector<32x128xf32>
    %cst_14 = arith.constant dense<0.000000e+00> : vector<8x128xf32>
    %16 = tpu.matmul %10, %15, %cst_14 {dimension_numbers = #tpu.dot_dimension_numbers<[1], [0], [0], [1], [0, 0, 1, 1], [], []>} : vector<8x32xf32>, vector<32x128xf32>, vector<8x128xf32> -> vector<8x128xf32>
    %17 = arith.addf %14, %16 : vector<8x128xf32>
    %18 = vector.extract_strided_slice %17 {offsets = [0, 0], sizes = [8, 96], strides = [1, 1]} : vector<8x128xf32> to vector<8x96xf32>
    %19 = arith.negf %18 : vector<8x96xf32>
    %20 = math.exp %19 : vector<8x96xf32>
    %cst_15 = arith.constant 1.000000e+00 : f32
    %21 = vector.broadcast %cst_15 : f32 to vector<8x96xf32>
    %22 = arith.addf %21, %20 : vector<8x96xf32>
    %23 = arith.divf %21, %22 : vector<8x96xf32>
    %24 = vector.extract_strided_slice %23 {offsets = [0, 0], sizes = [8, 32], strides = [1, 1]} : vector<8x96xf32> to vector<8x32xf32>
    %25 = vector.extract_strided_slice %23 {offsets = [0, 32], sizes = [8, 32], strides = [1, 1]} : vector<8x96xf32> to vector<8x32xf32>
    %26 = vector.extract_strided_slice %23 {offsets = [0, 64], sizes = [8, 32], strides = [1, 1]} : vector<8x96xf32> to vector<8x32xf32>
    %27 = vector.extract_strided_slice %17 {offsets = [0, 96], sizes = [8, 32], strides = [1, 1]} : vector<8x128xf32> to vector<8x32xf32>
    %28 = math.tanh %27 : vector<8x32xf32>
    %29 = arith.mulf %25, %10 : vector<8x32xf32>
    %30 = arith.mulf %24, %28 : vector<8x32xf32>
    %31 = arith.addf %29, %30 : vector<8x32xf32>
    %32 = math.tanh %31 : vector<8x32xf32>
    %33 = arith.mulf %26, %32 : vector<8x32xf32>
    %34 = arith.cmpi eq, %c0_i32, %8 : i32
    %35 = arith.select %34, %33, %10 : vector<8x32xf32>
    %c1_i32_16 = arith.constant 1 : i32
    %c8_i32_17 = arith.constant 8 : i32
    %36 = arith.muli %c1_i32_16, %c8_i32_17 : i32
    %37 = tpu.assume_multiple %36, 8 : i32
    %38 = arith.index_cast %37 : i32 to index
    %c0_18 = arith.constant 0 : index
    %39 = vector.load %arg18[%38, %c0_18] : memref<128x128xf32, #tpu.memory_space<vmem>>, vector<8x128xf32>
    %c0_19 = arith.constant 0 : index
    %c0_20 = arith.constant 0 : index
    %40 = vector.load %arg7[%c0_19, %c0_20] : memref<32x128xf32, #tpu.memory_space<vmem>>, vector<32x128xf32>
    %cst_21 = arith.constant dense<0.000000e+00> : vector<8x128xf32>
    %41 = tpu.matmul %33, %40, %cst_21 {dimension_numbers = #tpu.dot_dimension_numbers<[1], [0], [0], [1], [0, 0, 1, 1], [], []>} : vector<8x32xf32>, vector<32x128xf32>, vector<8x128xf32> -> vector<8x128xf32>
    %42 = arith.addf %39, %41 : vector<8x128xf32>
    %43 = vector.extract_strided_slice %42 {offsets = [0, 0], sizes = [8, 96], strides = [1, 1]} : vector<8x128xf32> to vector<8x96xf32>
    %44 = arith.negf %43 : vector<8x96xf32>
    %45 = math.exp %44 : vector<8x96xf32>
    %cst_22 = arith.constant 1.000000e+00 : f32
    %46 = vector.broadcast %cst_22 : f32 to vector<8x96xf32>
    %47 = arith.addf %46, %45 : vector<8x96xf32>
    %48 = arith.divf %46, %47 : vector<8x96xf32>
    %49 = vector.extract_strided_slice %48 {offsets = [0, 0], sizes = [8, 32], strides = [1, 1]} : vector<8x96xf32> to vector<8x32xf32>
    %50 = vector.extract_strided_slice %48 {offsets = [0, 32], sizes = [8, 32], strides = [1, 1]} : vector<8x96xf32> to vector<8x32xf32>
    %51 = vector.extract_strided_slice %48 {offsets = [0, 64], sizes = [8, 32], strides = [1, 1]} : vector<8x96xf32> to vector<8x32xf32>
    %52 = vector.extract_strided_slice %42 {offsets = [0, 96], sizes = [8, 32], strides = [1, 1]} : vector<8x128xf32> to vector<8x32xf32>
    %53 = math.tanh %52 : vector<8x32xf32>
    %54 = arith.mulf %50, %31 : vector<8x32xf32>
    %55 = arith.mulf %49, %53 : vector<8x32xf32>
    %56 = arith.addf %54, %55 : vector<8x32xf32>
    %57 = math.tanh %56 : vector<8x32xf32>
    %58 = arith.mulf %51, %57 : vector<8x32xf32>
    %59 = arith.cmpi eq, %c1_i32_16, %8 : i32
    %60 = arith.select %59, %58, %35 : vector<8x32xf32>
    %c2_i32 = arith.constant 2 : i32
    %c8_i32_23 = arith.constant 8 : i32
    %61 = arith.muli %c2_i32, %c8_i32_23 : i32
    %62 = tpu.assume_multiple %61, 8 : i32
    %63 = arith.index_cast %62 : i32 to index
    %c0_24 = arith.constant 0 : index
    %64 = vector.load %arg18[%63, %c0_24] : memref<128x128xf32, #tpu.memory_space<vmem>>, vector<8x128xf32>
    %c0_25 = arith.constant 0 : index
    %c0_26 = arith.constant 0 : index
    %65 = vector.load %arg7[%c0_25, %c0_26] : memref<32x128xf32, #tpu.memory_space<vmem>>, vector<32x128xf32>
    %cst_27 = arith.constant dense<0.000000e+00> : vector<8x128xf32>
    %66 = tpu.matmul %58, %65, %cst_27 {dimension_numbers = #tpu.dot_dimension_numbers<[1], [0], [0], [1], [0, 0, 1, 1], [], []>} : vector<8x32xf32>, vector<32x128xf32>, vector<8x128xf32> -> vector<8x128xf32>
    %67 = arith.addf %64, %66 : vector<8x128xf32>
    %68 = vector.extract_strided_slice %67 {offsets = [0, 0], sizes = [8, 96], strides = [1, 1]} : vector<8x128xf32> to vector<8x96xf32>
    %69 = arith.negf %68 : vector<8x96xf32>
    %70 = math.exp %69 : vector<8x96xf32>
    %cst_28 = arith.constant 1.000000e+00 : f32
    %71 = vector.broadcast %cst_28 : f32 to vector<8x96xf32>
    %72 = arith.addf %71, %70 : vector<8x96xf32>
    %73 = arith.divf %71, %72 : vector<8x96xf32>
    %74 = vector.extract_strided_slice %73 {offsets = [0, 0], sizes = [8, 32], strides = [1, 1]} : vector<8x96xf32> to vector<8x32xf32>
    %75 = vector.extract_strided_slice %73 {offsets = [0, 32], sizes = [8, 32], strides = [1, 1]} : vector<8x96xf32> to vector<8x32xf32>
    %76 = vector.extract_strided_slice %73 {offsets = [0, 64], sizes = [8, 32], strides = [1, 1]} : vector<8x96xf32> to vector<8x32xf32>
    %77 = vector.extract_strided_slice %67 {offsets = [0, 96], sizes = [8, 32], strides = [1, 1]} : vector<8x128xf32> to vector<8x32xf32>
    %78 = math.tanh %77 : vector<8x32xf32>
    %79 = arith.mulf %75, %56 : vector<8x32xf32>
    %80 = arith.mulf %74, %78 : vector<8x32xf32>
    %81 = arith.addf %79, %80 : vector<8x32xf32>
    %82 = math.tanh %81 : vector<8x32xf32>
    %83 = arith.mulf %76, %82 : vector<8x32xf32>
    %84 = arith.cmpi eq, %c2_i32, %8 : i32
    %85 = arith.select %84, %83, %60 : vector<8x32xf32>
    %c3_i32 = arith.constant 3 : i32
    %c8_i32_29 = arith.constant 8 : i32
    %86 = arith.muli %c3_i32, %c8_i32_29 : i32
    %87 = tpu.assume_multiple %86, 8 : i32
    %88 = arith.index_cast %87 : i32 to index
    %c0_30 = arith.constant 0 : index
    %89 = vector.load %arg18[%88, %c0_30] : memref<128x128xf32, #tpu.memory_space<vmem>>, vector<8x128xf32>
    %c0_31 = arith.constant 0 : index
    %c0_32 = arith.constant 0 : index
    %90 = vector.load %arg7[%c0_31, %c0_32] : memref<32x128xf32, #tpu.memory_space<vmem>>, vector<32x128xf32>
    %cst_33 = arith.constant dense<0.000000e+00> : vector<8x128xf32>
    %91 = tpu.matmul %83, %90, %cst_33 {dimension_numbers = #tpu.dot_dimension_numbers<[1], [0], [0], [1], [0, 0, 1, 1], [], []>} : vector<8x32xf32>, vector<32x128xf32>, vector<8x128xf32> -> vector<8x128xf32>
    %92 = arith.addf %89, %91 : vector<8x128xf32>
    %93 = vector.extract_strided_slice %92 {offsets = [0, 0], sizes = [8, 96], strides = [1, 1]} : vector<8x128xf32> to vector<8x96xf32>
    %94 = arith.negf %93 : vector<8x96xf32>
    %95 = math.exp %94 : vector<8x96xf32>
    %cst_34 = arith.constant 1.000000e+00 : f32
    %96 = vector.broadcast %cst_34 : f32 to vector<8x96xf32>
    %97 = arith.addf %96, %95 : vector<8x96xf32>
    %98 = arith.divf %96, %97 : vector<8x96xf32>
    %99 = vector.extract_strided_slice %98 {offsets = [0, 0], sizes = [8, 32], strides = [1, 1]} : vector<8x96xf32> to vector<8x32xf32>
    %100 = vector.extract_strided_slice %98 {offsets = [0, 32], sizes = [8, 32], strides = [1, 1]} : vector<8x96xf32> to vector<8x32xf32>
    %101 = vector.extract_strided_slice %98 {offsets = [0, 64], sizes = [8, 32], strides = [1, 1]} : vector<8x96xf32> to vector<8x32xf32>
    %102 = vector.extract_strided_slice %92 {offsets = [0, 96], sizes = [8, 32], strides = [1, 1]} : vector<8x128xf32> to vector<8x32xf32>
    %103 = math.tanh %102 : vector<8x32xf32>
    %104 = arith.mulf %100, %81 : vector<8x32xf32>
    %105 = arith.mulf %99, %103 : vector<8x32xf32>
    %106 = arith.addf %104, %105 : vector<8x32xf32>
    %107 = math.tanh %106 : vector<8x32xf32>
    %108 = arith.mulf %101, %107 : vector<8x32xf32>
    %109 = arith.cmpi eq, %c3_i32, %8 : i32
    %110 = arith.select %109, %108, %85 : vector<8x32xf32>
    %c4_i32 = arith.constant 4 : i32
    %c8_i32_35 = arith.constant 8 : i32
    %111 = arith.muli %c4_i32, %c8_i32_35 : i32
    %112 = tpu.assume_multiple %111, 8 : i32
    %113 = arith.index_cast %112 : i32 to index
    %c0_36 = arith.constant 0 : index
    %114 = vector.load %arg18[%113, %c0_36] : memref<128x128xf32, #tpu.memory_space<vmem>>, vector<8x128xf32>
    %c0_37 = arith.constant 0 : index
    %c0_38 = arith.constant 0 : index
    %115 = vector.load %arg7[%c0_37, %c0_38] : memref<32x128xf32, #tpu.memory_space<vmem>>, vector<32x128xf32>
    %cst_39 = arith.constant dense<0.000000e+00> : vector<8x128xf32>
    %116 = tpu.matmul %108, %115, %cst_39 {dimension_numbers = #tpu.dot_dimension_numbers<[1], [0], [0], [1], [0, 0, 1, 1], [], []>} : vector<8x32xf32>, vector<32x128xf32>, vector<8x128xf32> -> vector<8x128xf32>
    %117 = arith.addf %114, %116 : vector<8x128xf32>
    %118 = vector.extract_strided_slice %117 {offsets = [0, 0], sizes = [8, 96], strides = [1, 1]} : vector<8x128xf32> to vector<8x96xf32>
    %119 = arith.negf %118 : vector<8x96xf32>
    %120 = math.exp %119 : vector<8x96xf32>
    %cst_40 = arith.constant 1.000000e+00 : f32
    %121 = vector.broadcast %cst_40 : f32 to vector<8x96xf32>
    %122 = arith.addf %121, %120 : vector<8x96xf32>
    %123 = arith.divf %121, %122 : vector<8x96xf32>
    %124 = vector.extract_strided_slice %123 {offsets = [0, 0], sizes = [8, 32], strides = [1, 1]} : vector<8x96xf32> to vector<8x32xf32>
    %125 = vector.extract_strided_slice %123 {offsets = [0, 32], sizes = [8, 32], strides = [1, 1]} : vector<8x96xf32> to vector<8x32xf32>
    %126 = vector.extract_strided_slice %123 {offsets = [0, 64], sizes = [8, 32], strides = [1, 1]} : vector<8x96xf32> to vector<8x32xf32>
    %127 = vector.extract_strided_slice %117 {offsets = [0, 96], sizes = [8, 32], strides = [1, 1]} : vector<8x128xf32> to vector<8x32xf32>
    %128 = math.tanh %127 : vector<8x32xf32>
    %129 = arith.mulf %125, %106 : vector<8x32xf32>
    %130 = arith.mulf %124, %128 : vector<8x32xf32>
    %131 = arith.addf %129, %130 : vector<8x32xf32>
    %132 = math.tanh %131 : vector<8x32xf32>
    %133 = arith.mulf %126, %132 : vector<8x32xf32>
    %134 = arith.cmpi eq, %c4_i32, %8 : i32
    %135 = arith.select %134, %133, %110 : vector<8x32xf32>
    %c5_i32 = arith.constant 5 : i32
    %c8_i32_41 = arith.constant 8 : i32
    %136 = arith.muli %c5_i32, %c8_i32_41 : i32
    %137 = tpu.assume_multiple %136, 8 : i32
    %138 = arith.index_cast %137 : i32 to index
    %c0_42 = arith.constant 0 : index
    %139 = vector.load %arg18[%138, %c0_42] : memref<128x128xf32, #tpu.memory_space<vmem>>, vector<8x128xf32>
    %c0_43 = arith.constant 0 : index
    %c0_44 = arith.constant 0 : index
    %140 = vector.load %arg7[%c0_43, %c0_44] : memref<32x128xf32, #tpu.memory_space<vmem>>, vector<32x128xf32>
    %cst_45 = arith.constant dense<0.000000e+00> : vector<8x128xf32>
    %141 = tpu.matmul %133, %140, %cst_45 {dimension_numbers = #tpu.dot_dimension_numbers<[1], [0], [0], [1], [0, 0, 1, 1], [], []>} : vector<8x32xf32>, vector<32x128xf32>, vector<8x128xf32> -> vector<8x128xf32>
    %142 = arith.addf %139, %141 : vector<8x128xf32>
    %143 = vector.extract_strided_slice %142 {offsets = [0, 0], sizes = [8, 96], strides = [1, 1]} : vector<8x128xf32> to vector<8x96xf32>
    %144 = arith.negf %143 : vector<8x96xf32>
    %145 = math.exp %144 : vector<8x96xf32>
    %cst_46 = arith.constant 1.000000e+00 : f32
    %146 = vector.broadcast %cst_46 : f32 to vector<8x96xf32>
    %147 = arith.addf %146, %145 : vector<8x96xf32>
    %148 = arith.divf %146, %147 : vector<8x96xf32>
    %149 = vector.extract_strided_slice %148 {offsets = [0, 0], sizes = [8, 32], strides = [1, 1]} : vector<8x96xf32> to vector<8x32xf32>
    %150 = vector.extract_strided_slice %148 {offsets = [0, 32], sizes = [8, 32], strides = [1, 1]} : vector<8x96xf32> to vector<8x32xf32>
    %151 = vector.extract_strided_slice %148 {offsets = [0, 64], sizes = [8, 32], strides = [1, 1]} : vector<8x96xf32> to vector<8x32xf32>
    %152 = vector.extract_strided_slice %142 {offsets = [0, 96], sizes = [8, 32], strides = [1, 1]} : vector<8x128xf32> to vector<8x32xf32>
    %153 = math.tanh %152 : vector<8x32xf32>
    %154 = arith.mulf %150, %131 : vector<8x32xf32>
    %155 = arith.mulf %149, %153 : vector<8x32xf32>
    %156 = arith.addf %154, %155 : vector<8x32xf32>
    %157 = math.tanh %156 : vector<8x32xf32>
    %158 = arith.mulf %151, %157 : vector<8x32xf32>
    %159 = arith.cmpi eq, %c5_i32, %8 : i32
    %160 = arith.select %159, %158, %135 : vector<8x32xf32>
    %c6_i32 = arith.constant 6 : i32
    %c8_i32_47 = arith.constant 8 : i32
    %161 = arith.muli %c6_i32, %c8_i32_47 : i32
    %162 = tpu.assume_multiple %161, 8 : i32
    %163 = arith.index_cast %162 : i32 to index
    %c0_48 = arith.constant 0 : index
    %164 = vector.load %arg18[%163, %c0_48] : memref<128x128xf32, #tpu.memory_space<vmem>>, vector<8x128xf32>
    %c0_49 = arith.constant 0 : index
    %c0_50 = arith.constant 0 : index
    %165 = vector.load %arg7[%c0_49, %c0_50] : memref<32x128xf32, #tpu.memory_space<vmem>>, vector<32x128xf32>
    %cst_51 = arith.constant dense<0.000000e+00> : vector<8x128xf32>
    %166 = tpu.matmul %158, %165, %cst_51 {dimension_numbers = #tpu.dot_dimension_numbers<[1], [0], [0], [1], [0, 0, 1, 1], [], []>} : vector<8x32xf32>, vector<32x128xf32>, vector<8x128xf32> -> vector<8x128xf32>
    %167 = arith.addf %164, %166 : vector<8x128xf32>
    %168 = vector.extract_strided_slice %167 {offsets = [0, 0], sizes = [8, 96], strides = [1, 1]} : vector<8x128xf32> to vector<8x96xf32>
    %169 = arith.negf %168 : vector<8x96xf32>
    %170 = math.exp %169 : vector<8x96xf32>
    %cst_52 = arith.constant 1.000000e+00 : f32
    %171 = vector.broadcast %cst_52 : f32 to vector<8x96xf32>
    %172 = arith.addf %171, %170 : vector<8x96xf32>
    %173 = arith.divf %171, %172 : vector<8x96xf32>
    %174 = vector.extract_strided_slice %173 {offsets = [0, 0], sizes = [8, 32], strides = [1, 1]} : vector<8x96xf32> to vector<8x32xf32>
    %175 = vector.extract_strided_slice %173 {offsets = [0, 32], sizes = [8, 32], strides = [1, 1]} : vector<8x96xf32> to vector<8x32xf32>
    %176 = vector.extract_strided_slice %173 {offsets = [0, 64], sizes = [8, 32], strides = [1, 1]} : vector<8x96xf32> to vector<8x32xf32>
    %177 = vector.extract_strided_slice %167 {offsets = [0, 96], sizes = [8, 32], strides = [1, 1]} : vector<8x128xf32> to vector<8x32xf32>
    %178 = math.tanh %177 : vector<8x32xf32>
    %179 = arith.mulf %175, %156 : vector<8x32xf32>
    %180 = arith.mulf %174, %178 : vector<8x32xf32>
    %181 = arith.addf %179, %180 : vector<8x32xf32>
    %182 = math.tanh %181 : vector<8x32xf32>
    %183 = arith.mulf %176, %182 : vector<8x32xf32>
    %184 = arith.cmpi eq, %c6_i32, %8 : i32
    %185 = arith.select %184, %183, %160 : vector<8x32xf32>
    %c7_i32 = arith.constant 7 : i32
    %c8_i32_53 = arith.constant 8 : i32
    %186 = arith.muli %c7_i32, %c8_i32_53 : i32
    %187 = tpu.assume_multiple %186, 8 : i32
    %188 = arith.index_cast %187 : i32 to index
    %c0_54 = arith.constant 0 : index
    %189 = vector.load %arg18[%188, %c0_54] : memref<128x128xf32, #tpu.memory_space<vmem>>, vector<8x128xf32>
    %c0_55 = arith.constant 0 : index
    %c0_56 = arith.constant 0 : index
    %190 = vector.load %arg7[%c0_55, %c0_56] : memref<32x128xf32, #tpu.memory_space<vmem>>, vector<32x128xf32>
    %cst_57 = arith.constant dense<0.000000e+00> : vector<8x128xf32>
    %191 = tpu.matmul %183, %190, %cst_57 {dimension_numbers = #tpu.dot_dimension_numbers<[1], [0], [0], [1], [0, 0, 1, 1], [], []>} : vector<8x32xf32>, vector<32x128xf32>, vector<8x128xf32> -> vector<8x128xf32>
    %192 = arith.addf %189, %191 : vector<8x128xf32>
    %193 = vector.extract_strided_slice %192 {offsets = [0, 0], sizes = [8, 96], strides = [1, 1]} : vector<8x128xf32> to vector<8x96xf32>
    %194 = arith.negf %193 : vector<8x96xf32>
    %195 = math.exp %194 : vector<8x96xf32>
    %cst_58 = arith.constant 1.000000e+00 : f32
    %196 = vector.broadcast %cst_58 : f32 to vector<8x96xf32>
    %197 = arith.addf %196, %195 : vector<8x96xf32>
    %198 = arith.divf %196, %197 : vector<8x96xf32>
    %199 = vector.extract_strided_slice %198 {offsets = [0, 0], sizes = [8, 32], strides = [1, 1]} : vector<8x96xf32> to vector<8x32xf32>
    %200 = vector.extract_strided_slice %198 {offsets = [0, 32], sizes = [8, 32], strides = [1, 1]} : vector<8x96xf32> to vector<8x32xf32>
    %201 = vector.extract_strided_slice %198 {offsets = [0, 64], sizes = [8, 32], strides = [1, 1]} : vector<8x96xf32> to vector<8x32xf32>
    %202 = vector.extract_strided_slice %192 {offsets = [0, 96], sizes = [8, 32], strides = [1, 1]} : vector<8x128xf32> to vector<8x32xf32>
    %203 = math.tanh %202 : vector<8x32xf32>
    %204 = arith.mulf %200, %181 : vector<8x32xf32>
    %205 = arith.mulf %199, %203 : vector<8x32xf32>
    %206 = arith.addf %204, %205 : vector<8x32xf32>
    %207 = math.tanh %206 : vector<8x32xf32>
    %208 = arith.mulf %201, %207 : vector<8x32xf32>
    %209 = arith.cmpi eq, %c7_i32, %8 : i32
    %210 = arith.select %209, %208, %185 : vector<8x32xf32>
    %c8_i32_59 = arith.constant 8 : i32
    %c8_i32_60 = arith.constant 8 : i32
    %211 = arith.muli %c8_i32_59, %c8_i32_60 : i32
    %212 = tpu.assume_multiple %211, 8 : i32
    %213 = arith.index_cast %212 : i32 to index
    %c0_61 = arith.constant 0 : index
    %214 = vector.load %arg18[%213, %c0_61] : memref<128x128xf32, #tpu.memory_space<vmem>>, vector<8x128xf32>
    %c0_62 = arith.constant 0 : index
    %c0_63 = arith.constant 0 : index
    %215 = vector.load %arg7[%c0_62, %c0_63] : memref<32x128xf32, #tpu.memory_space<vmem>>, vector<32x128xf32>
    %cst_64 = arith.constant dense<0.000000e+00> : vector<8x128xf32>
    %216 = tpu.matmul %208, %215, %cst_64 {dimension_numbers = #tpu.dot_dimension_numbers<[1], [0], [0], [1], [0, 0, 1, 1], [], []>} : vector<8x32xf32>, vector<32x128xf32>, vector<8x128xf32> -> vector<8x128xf32>
    %217 = arith.addf %214, %216 : vector<8x128xf32>
    %218 = vector.extract_strided_slice %217 {offsets = [0, 0], sizes = [8, 96], strides = [1, 1]} : vector<8x128xf32> to vector<8x96xf32>
    %219 = arith.negf %218 : vector<8x96xf32>
    %220 = math.exp %219 : vector<8x96xf32>
    %cst_65 = arith.constant 1.000000e+00 : f32
    %221 = vector.broadcast %cst_65 : f32 to vector<8x96xf32>
    %222 = arith.addf %221, %220 : vector<8x96xf32>
    %223 = arith.divf %221, %222 : vector<8x96xf32>
    %224 = vector.extract_strided_slice %223 {offsets = [0, 0], sizes = [8, 32], strides = [1, 1]} : vector<8x96xf32> to vector<8x32xf32>
    %225 = vector.extract_strided_slice %223 {offsets = [0, 32], sizes = [8, 32], strides = [1, 1]} : vector<8x96xf32> to vector<8x32xf32>
    %226 = vector.extract_strided_slice %223 {offsets = [0, 64], sizes = [8, 32], strides = [1, 1]} : vector<8x96xf32> to vector<8x32xf32>
    %227 = vector.extract_strided_slice %217 {offsets = [0, 96], sizes = [8, 32], strides = [1, 1]} : vector<8x128xf32> to vector<8x32xf32>
    %228 = math.tanh %227 : vector<8x32xf32>
    %229 = arith.mulf %225, %206 : vector<8x32xf32>
    %230 = arith.mulf %224, %228 : vector<8x32xf32>
    %231 = arith.addf %229, %230 : vector<8x32xf32>
    %232 = math.tanh %231 : vector<8x32xf32>
    %233 = arith.mulf %226, %232 : vector<8x32xf32>
    %234 = arith.cmpi eq, %c8_i32_59, %8 : i32
    %235 = arith.select %234, %233, %210 : vector<8x32xf32>
    %c9_i32 = arith.constant 9 : i32
    %c8_i32_66 = arith.constant 8 : i32
    %236 = arith.muli %c9_i32, %c8_i32_66 : i32
    %237 = tpu.assume_multiple %236, 8 : i32
    %238 = arith.index_cast %237 : i32 to index
    %c0_67 = arith.constant 0 : index
    %239 = vector.load %arg18[%238, %c0_67] : memref<128x128xf32, #tpu.memory_space<vmem>>, vector<8x128xf32>
    %c0_68 = arith.constant 0 : index
    %c0_69 = arith.constant 0 : index
    %240 = vector.load %arg7[%c0_68, %c0_69] : memref<32x128xf32, #tpu.memory_space<vmem>>, vector<32x128xf32>
    %cst_70 = arith.constant dense<0.000000e+00> : vector<8x128xf32>
    %241 = tpu.matmul %233, %240, %cst_70 {dimension_numbers = #tpu.dot_dimension_numbers<[1], [0], [0], [1], [0, 0, 1, 1], [], []>} : vector<8x32xf32>, vector<32x128xf32>, vector<8x128xf32> -> vector<8x128xf32>
    %242 = arith.addf %239, %241 : vector<8x128xf32>
    %243 = vector.extract_strided_slice %242 {offsets = [0, 0], sizes = [8, 96], strides = [1, 1]} : vector<8x128xf32> to vector<8x96xf32>
    %244 = arith.negf %243 : vector<8x96xf32>
    %245 = math.exp %244 : vector<8x96xf32>
    %cst_71 = arith.constant 1.000000e+00 : f32
    %246 = vector.broadcast %cst_71 : f32 to vector<8x96xf32>
    %247 = arith.addf %246, %245 : vector<8x96xf32>
    %248 = arith.divf %246, %247 : vector<8x96xf32>
    %249 = vector.extract_strided_slice %248 {offsets = [0, 0], sizes = [8, 32], strides = [1, 1]} : vector<8x96xf32> to vector<8x32xf32>
    %250 = vector.extract_strided_slice %248 {offsets = [0, 32], sizes = [8, 32], strides = [1, 1]} : vector<8x96xf32> to vector<8x32xf32>
    %251 = vector.extract_strided_slice %248 {offsets = [0, 64], sizes = [8, 32], strides = [1, 1]} : vector<8x96xf32> to vector<8x32xf32>
    %252 = vector.extract_strided_slice %242 {offsets = [0, 96], sizes = [8, 32], strides = [1, 1]} : vector<8x128xf32> to vector<8x32xf32>
    %253 = math.tanh %252 : vector<8x32xf32>
    %254 = arith.mulf %250, %231 : vector<8x32xf32>
    %255 = arith.mulf %249, %253 : vector<8x32xf32>
    %256 = arith.addf %254, %255 : vector<8x32xf32>
    %257 = math.tanh %256 : vector<8x32xf32>
    %258 = arith.mulf %251, %257 : vector<8x32xf32>
    %259 = arith.cmpi eq, %c9_i32, %8 : i32
    %260 = arith.select %259, %258, %235 : vector<8x32xf32>
    %c10_i32 = arith.constant 10 : i32
    %c8_i32_72 = arith.constant 8 : i32
    %261 = arith.muli %c10_i32, %c8_i32_72 : i32
    %262 = tpu.assume_multiple %261, 8 : i32
    %263 = arith.index_cast %262 : i32 to index
    %c0_73 = arith.constant 0 : index
    %264 = vector.load %arg18[%263, %c0_73] : memref<128x128xf32, #tpu.memory_space<vmem>>, vector<8x128xf32>
    %c0_74 = arith.constant 0 : index
    %c0_75 = arith.constant 0 : index
    %265 = vector.load %arg7[%c0_74, %c0_75] : memref<32x128xf32, #tpu.memory_space<vmem>>, vector<32x128xf32>
    %cst_76 = arith.constant dense<0.000000e+00> : vector<8x128xf32>
    %266 = tpu.matmul %258, %265, %cst_76 {dimension_numbers = #tpu.dot_dimension_numbers<[1], [0], [0], [1], [0, 0, 1, 1], [], []>} : vector<8x32xf32>, vector<32x128xf32>, vector<8x128xf32> -> vector<8x128xf32>
    %267 = arith.addf %264, %266 : vector<8x128xf32>
    %268 = vector.extract_strided_slice %267 {offsets = [0, 0], sizes = [8, 96], strides = [1, 1]} : vector<8x128xf32> to vector<8x96xf32>
    %269 = arith.negf %268 : vector<8x96xf32>
    %270 = math.exp %269 : vector<8x96xf32>
    %cst_77 = arith.constant 1.000000e+00 : f32
    %271 = vector.broadcast %cst_77 : f32 to vector<8x96xf32>
    %272 = arith.addf %271, %270 : vector<8x96xf32>
    %273 = arith.divf %271, %272 : vector<8x96xf32>
    %274 = vector.extract_strided_slice %273 {offsets = [0, 0], sizes = [8, 32], strides = [1, 1]} : vector<8x96xf32> to vector<8x32xf32>
    %275 = vector.extract_strided_slice %273 {offsets = [0, 32], sizes = [8, 32], strides = [1, 1]} : vector<8x96xf32> to vector<8x32xf32>
    %276 = vector.extract_strided_slice %273 {offsets = [0, 64], sizes = [8, 32], strides = [1, 1]} : vector<8x96xf32> to vector<8x32xf32>
    %277 = vector.extract_strided_slice %267 {offsets = [0, 96], sizes = [8, 32], strides = [1, 1]} : vector<8x128xf32> to vector<8x32xf32>
    %278 = math.tanh %277 : vector<8x32xf32>
    %279 = arith.mulf %275, %256 : vector<8x32xf32>
    %280 = arith.mulf %274, %278 : vector<8x32xf32>
    %281 = arith.addf %279, %280 : vector<8x32xf32>
    %282 = math.tanh %281 : vector<8x32xf32>
    %283 = arith.mulf %276, %282 : vector<8x32xf32>
    %284 = arith.cmpi eq, %c10_i32, %8 : i32
    %285 = arith.select %284, %283, %260 : vector<8x32xf32>
    %c11_i32 = arith.constant 11 : i32
    %c8_i32_78 = arith.constant 8 : i32
    %286 = arith.muli %c11_i32, %c8_i32_78 : i32
    %287 = tpu.assume_multiple %286, 8 : i32
    %288 = arith.index_cast %287 : i32 to index
    %c0_79 = arith.constant 0 : index
    %289 = vector.load %arg18[%288, %c0_79] : memref<128x128xf32, #tpu.memory_space<vmem>>, vector<8x128xf32>
    %c0_80 = arith.constant 0 : index
    %c0_81 = arith.constant 0 : index
    %290 = vector.load %arg7[%c0_80, %c0_81] : memref<32x128xf32, #tpu.memory_space<vmem>>, vector<32x128xf32>
    %cst_82 = arith.constant dense<0.000000e+00> : vector<8x128xf32>
    %291 = tpu.matmul %283, %290, %cst_82 {dimension_numbers = #tpu.dot_dimension_numbers<[1], [0], [0], [1], [0, 0, 1, 1], [], []>} : vector<8x32xf32>, vector<32x128xf32>, vector<8x128xf32> -> vector<8x128xf32>
    %292 = arith.addf %289, %291 : vector<8x128xf32>
    %293 = vector.extract_strided_slice %292 {offsets = [0, 0], sizes = [8, 96], strides = [1, 1]} : vector<8x128xf32> to vector<8x96xf32>
    %294 = arith.negf %293 : vector<8x96xf32>
    %295 = math.exp %294 : vector<8x96xf32>
    %cst_83 = arith.constant 1.000000e+00 : f32
    %296 = vector.broadcast %cst_83 : f32 to vector<8x96xf32>
    %297 = arith.addf %296, %295 : vector<8x96xf32>
    %298 = arith.divf %296, %297 : vector<8x96xf32>
    %299 = vector.extract_strided_slice %298 {offsets = [0, 0], sizes = [8, 32], strides = [1, 1]} : vector<8x96xf32> to vector<8x32xf32>
    %300 = vector.extract_strided_slice %298 {offsets = [0, 32], sizes = [8, 32], strides = [1, 1]} : vector<8x96xf32> to vector<8x32xf32>
    %301 = vector.extract_strided_slice %298 {offsets = [0, 64], sizes = [8, 32], strides = [1, 1]} : vector<8x96xf32> to vector<8x32xf32>
    %302 = vector.extract_strided_slice %292 {offsets = [0, 96], sizes = [8, 32], strides = [1, 1]} : vector<8x128xf32> to vector<8x32xf32>
    %303 = math.tanh %302 : vector<8x32xf32>
    %304 = arith.mulf %300, %281 : vector<8x32xf32>
    %305 = arith.mulf %299, %303 : vector<8x32xf32>
    %306 = arith.addf %304, %305 : vector<8x32xf32>
    %307 = math.tanh %306 : vector<8x32xf32>
    %308 = arith.mulf %301, %307 : vector<8x32xf32>
    %309 = arith.cmpi eq, %c11_i32, %8 : i32
    %310 = arith.select %309, %308, %285 : vector<8x32xf32>
    %c12_i32 = arith.constant 12 : i32
    %c8_i32_84 = arith.constant 8 : i32
    %311 = arith.muli %c12_i32, %c8_i32_84 : i32
    %312 = tpu.assume_multiple %311, 8 : i32
    %313 = arith.index_cast %312 : i32 to index
    %c0_85 = arith.constant 0 : index
    %314 = vector.load %arg18[%313, %c0_85] : memref<128x128xf32, #tpu.memory_space<vmem>>, vector<8x128xf32>
    %c0_86 = arith.constant 0 : index
    %c0_87 = arith.constant 0 : index
    %315 = vector.load %arg7[%c0_86, %c0_87] : memref<32x128xf32, #tpu.memory_space<vmem>>, vector<32x128xf32>
    %cst_88 = arith.constant dense<0.000000e+00> : vector<8x128xf32>
    %316 = tpu.matmul %308, %315, %cst_88 {dimension_numbers = #tpu.dot_dimension_numbers<[1], [0], [0], [1], [0, 0, 1, 1], [], []>} : vector<8x32xf32>, vector<32x128xf32>, vector<8x128xf32> -> vector<8x128xf32>
    %317 = arith.addf %314, %316 : vector<8x128xf32>
    %318 = vector.extract_strided_slice %317 {offsets = [0, 0], sizes = [8, 96], strides = [1, 1]} : vector<8x128xf32> to vector<8x96xf32>
    %319 = arith.negf %318 : vector<8x96xf32>
    %320 = math.exp %319 : vector<8x96xf32>
    %cst_89 = arith.constant 1.000000e+00 : f32
    %321 = vector.broadcast %cst_89 : f32 to vector<8x96xf32>
    %322 = arith.addf %321, %320 : vector<8x96xf32>
    %323 = arith.divf %321, %322 : vector<8x96xf32>
    %324 = vector.extract_strided_slice %323 {offsets = [0, 0], sizes = [8, 32], strides = [1, 1]} : vector<8x96xf32> to vector<8x32xf32>
    %325 = vector.extract_strided_slice %323 {offsets = [0, 32], sizes = [8, 32], strides = [1, 1]} : vector<8x96xf32> to vector<8x32xf32>
    %326 = vector.extract_strided_slice %323 {offsets = [0, 64], sizes = [8, 32], strides = [1, 1]} : vector<8x96xf32> to vector<8x32xf32>
    %327 = vector.extract_strided_slice %317 {offsets = [0, 96], sizes = [8, 32], strides = [1, 1]} : vector<8x128xf32> to vector<8x32xf32>
    %328 = math.tanh %327 : vector<8x32xf32>
    %329 = arith.mulf %325, %306 : vector<8x32xf32>
    %330 = arith.mulf %324, %328 : vector<8x32xf32>
    %331 = arith.addf %329, %330 : vector<8x32xf32>
    %332 = math.tanh %331 : vector<8x32xf32>
    %333 = arith.mulf %326, %332 : vector<8x32xf32>
    %334 = arith.cmpi eq, %c12_i32, %8 : i32
    %335 = arith.select %334, %333, %310 : vector<8x32xf32>
    %c13_i32 = arith.constant 13 : i32
    %c8_i32_90 = arith.constant 8 : i32
    %336 = arith.muli %c13_i32, %c8_i32_90 : i32
    %337 = tpu.assume_multiple %336, 8 : i32
    %338 = arith.index_cast %337 : i32 to index
    %c0_91 = arith.constant 0 : index
    %339 = vector.load %arg18[%338, %c0_91] : memref<128x128xf32, #tpu.memory_space<vmem>>, vector<8x128xf32>
    %c0_92 = arith.constant 0 : index
    %c0_93 = arith.constant 0 : index
    %340 = vector.load %arg7[%c0_92, %c0_93] : memref<32x128xf32, #tpu.memory_space<vmem>>, vector<32x128xf32>
    %cst_94 = arith.constant dense<0.000000e+00> : vector<8x128xf32>
    %341 = tpu.matmul %333, %340, %cst_94 {dimension_numbers = #tpu.dot_dimension_numbers<[1], [0], [0], [1], [0, 0, 1, 1], [], []>} : vector<8x32xf32>, vector<32x128xf32>, vector<8x128xf32> -> vector<8x128xf32>
    %342 = arith.addf %339, %341 : vector<8x128xf32>
    %343 = vector.extract_strided_slice %342 {offsets = [0, 0], sizes = [8, 96], strides = [1, 1]} : vector<8x128xf32> to vector<8x96xf32>
    %344 = arith.negf %343 : vector<8x96xf32>
    %345 = math.exp %344 : vector<8x96xf32>
    %cst_95 = arith.constant 1.000000e+00 : f32
    %346 = vector.broadcast %cst_95 : f32 to vector<8x96xf32>
    %347 = arith.addf %346, %345 : vector<8x96xf32>
    %348 = arith.divf %346, %347 : vector<8x96xf32>
    %349 = vector.extract_strided_slice %348 {offsets = [0, 0], sizes = [8, 32], strides = [1, 1]} : vector<8x96xf32> to vector<8x32xf32>
    %350 = vector.extract_strided_slice %348 {offsets = [0, 32], sizes = [8, 32], strides = [1, 1]} : vector<8x96xf32> to vector<8x32xf32>
    %351 = vector.extract_strided_slice %348 {offsets = [0, 64], sizes = [8, 32], strides = [1, 1]} : vector<8x96xf32> to vector<8x32xf32>
    %352 = vector.extract_strided_slice %342 {offsets = [0, 96], sizes = [8, 32], strides = [1, 1]} : vector<8x128xf32> to vector<8x32xf32>
    %353 = math.tanh %352 : vector<8x32xf32>
    %354 = arith.mulf %350, %331 : vector<8x32xf32>
    %355 = arith.mulf %349, %353 : vector<8x32xf32>
    %356 = arith.addf %354, %355 : vector<8x32xf32>
    %357 = math.tanh %356 : vector<8x32xf32>
    %358 = arith.mulf %351, %357 : vector<8x32xf32>
    %359 = arith.cmpi eq, %c13_i32, %8 : i32
    %360 = arith.select %359, %358, %335 : vector<8x32xf32>
    %c14_i32 = arith.constant 14 : i32
    %c8_i32_96 = arith.constant 8 : i32
    %361 = arith.muli %c14_i32, %c8_i32_96 : i32
    %362 = tpu.assume_multiple %361, 8 : i32
    %363 = arith.index_cast %362 : i32 to index
    %c0_97 = arith.constant 0 : index
    %364 = vector.load %arg18[%363, %c0_97] : memref<128x128xf32, #tpu.memory_space<vmem>>, vector<8x128xf32>
    %c0_98 = arith.constant 0 : index
    %c0_99 = arith.constant 0 : index
    %365 = vector.load %arg7[%c0_98, %c0_99] : memref<32x128xf32, #tpu.memory_space<vmem>>, vector<32x128xf32>
    %cst_100 = arith.constant dense<0.000000e+00> : vector<8x128xf32>
    %366 = tpu.matmul %358, %365, %cst_100 {dimension_numbers = #tpu.dot_dimension_numbers<[1], [0], [0], [1], [0, 0, 1, 1], [], []>} : vector<8x32xf32>, vector<32x128xf32>, vector<8x128xf32> -> vector<8x128xf32>
    %367 = arith.addf %364, %366 : vector<8x128xf32>
    %368 = vector.extract_strided_slice %367 {offsets = [0, 0], sizes = [8, 96], strides = [1, 1]} : vector<8x128xf32> to vector<8x96xf32>
    %369 = arith.negf %368 : vector<8x96xf32>
    %370 = math.exp %369 : vector<8x96xf32>
    %cst_101 = arith.constant 1.000000e+00 : f32
    %371 = vector.broadcast %cst_101 : f32 to vector<8x96xf32>
    %372 = arith.addf %371, %370 : vector<8x96xf32>
    %373 = arith.divf %371, %372 : vector<8x96xf32>
    %374 = vector.extract_strided_slice %373 {offsets = [0, 0], sizes = [8, 32], strides = [1, 1]} : vector<8x96xf32> to vector<8x32xf32>
    %375 = vector.extract_strided_slice %373 {offsets = [0, 32], sizes = [8, 32], strides = [1, 1]} : vector<8x96xf32> to vector<8x32xf32>
    %376 = vector.extract_strided_slice %373 {offsets = [0, 64], sizes = [8, 32], strides = [1, 1]} : vector<8x96xf32> to vector<8x32xf32>
    %377 = vector.extract_strided_slice %367 {offsets = [0, 96], sizes = [8, 32], strides = [1, 1]} : vector<8x128xf32> to vector<8x32xf32>
    %378 = math.tanh %377 : vector<8x32xf32>
    %379 = arith.mulf %375, %356 : vector<8x32xf32>
    %380 = arith.mulf %374, %378 : vector<8x32xf32>
    %381 = arith.addf %379, %380 : vector<8x32xf32>
    %382 = math.tanh %381 : vector<8x32xf32>
    %383 = arith.mulf %376, %382 : vector<8x32xf32>
    %384 = arith.cmpi eq, %c14_i32, %8 : i32
    %385 = arith.select %384, %383, %360 : vector<8x32xf32>
    %c15_i32 = arith.constant 15 : i32
    %c8_i32_102 = arith.constant 8 : i32
    %386 = arith.muli %c15_i32, %c8_i32_102 : i32
    %387 = tpu.assume_multiple %386, 8 : i32
    %388 = arith.index_cast %387 : i32 to index
    %c0_103 = arith.constant 0 : index
    %389 = vector.load %arg18[%388, %c0_103] : memref<128x128xf32, #tpu.memory_space<vmem>>, vector<8x128xf32>
    %c0_104 = arith.constant 0 : index
    %c0_105 = arith.constant 0 : index
    %390 = vector.load %arg7[%c0_104, %c0_105] : memref<32x128xf32, #tpu.memory_space<vmem>>, vector<32x128xf32>
    %cst_106 = arith.constant dense<0.000000e+00> : vector<8x128xf32>
    %391 = tpu.matmul %383, %390, %cst_106 {dimension_numbers = #tpu.dot_dimension_numbers<[1], [0], [0], [1], [0, 0, 1, 1], [], []>} : vector<8x32xf32>, vector<32x128xf32>, vector<8x128xf32> -> vector<8x128xf32>
    %392 = arith.addf %389, %391 : vector<8x128xf32>
    %393 = vector.extract_strided_slice %392 {offsets = [0, 0], sizes = [8, 96], strides = [1, 1]} : vector<8x128xf32> to vector<8x96xf32>
    %394 = arith.negf %393 : vector<8x96xf32>
    %395 = math.exp %394 : vector<8x96xf32>
    %cst_107 = arith.constant 1.000000e+00 : f32
    %396 = vector.broadcast %cst_107 : f32 to vector<8x96xf32>
    %397 = arith.addf %396, %395 : vector<8x96xf32>
    %398 = arith.divf %396, %397 : vector<8x96xf32>
    %399 = vector.extract_strided_slice %398 {offsets = [0, 0], sizes = [8, 32], strides = [1, 1]} : vector<8x96xf32> to vector<8x32xf32>
    %400 = vector.extract_strided_slice %398 {offsets = [0, 32], sizes = [8, 32], strides = [1, 1]} : vector<8x96xf32> to vector<8x32xf32>
    %401 = vector.extract_strided_slice %398 {offsets = [0, 64], sizes = [8, 32], strides = [1, 1]} : vector<8x96xf32> to vector<8x32xf32>
    %402 = vector.extract_strided_slice %392 {offsets = [0, 96], sizes = [8, 32], strides = [1, 1]} : vector<8x128xf32> to vector<8x32xf32>
    %403 = math.tanh %402 : vector<8x32xf32>
    %404 = arith.mulf %400, %381 : vector<8x32xf32>
    %405 = arith.mulf %399, %403 : vector<8x32xf32>
    %406 = arith.addf %404, %405 : vector<8x32xf32>
    %407 = math.tanh %406 : vector<8x32xf32>
    %408 = arith.mulf %401, %407 : vector<8x32xf32>
    %409 = arith.cmpi eq, %c15_i32, %8 : i32
    %410 = arith.select %409, %408, %385 : vector<8x32xf32>
    %c16_i32 = arith.constant 16 : i32
    %c8_i32_108 = arith.constant 8 : i32
    %411 = arith.muli %8, %c8_i32_108 : i32
    %412 = tpu.assume_multiple %411, 8 : i32
    %413 = arith.index_cast %412 : i32 to index
    %c0_109 = arith.constant 0 : index
    %414 = vector.load %arg2[%413, %c0_109] : memref<128x32xf32, #tpu.memory_space<vmem>>, vector<8x32xf32>
    %c0_110 = arith.constant 0 : index
    %c0_111 = arith.constant 0 : index
    %415 = vector.load %arg8[%c0_110, %c0_111] : memref<32x128xf32, #tpu.memory_space<vmem>>, vector<32x128xf32>
    %cst_112 = arith.constant dense<0.000000e+00> : vector<8x128xf32>
    %416 = tpu.matmul %414, %415, %cst_112 {dimension_numbers = #tpu.dot_dimension_numbers<[1], [0], [0], [1], [0, 0, 1, 1], [], []>} : vector<8x32xf32>, vector<32x128xf32>, vector<8x128xf32> -> vector<8x128xf32>
    %c0_113 = arith.constant 0 : index
    %c0_114 = arith.constant 0 : index
    %417 = vector.load %arg9[%c0_113, %c0_114] : memref<1x128xf32, #tpu.memory_space<vmem>>, vector<1x128xf32>
    %418 = vector.broadcast %417 : vector<1x128xf32> to vector<8x128xf32>
    %419 = arith.addf %416, %418 : vector<8x128xf32>
    %420 = vector.extract_strided_slice %419 {offsets = [0, 0], sizes = [8, 96], strides = [1, 1]} : vector<8x128xf32> to vector<8x96xf32>
    %421 = arith.negf %420 : vector<8x96xf32>
    %422 = math.exp %421 : vector<8x96xf32>
    %cst_115 = arith.constant 1.000000e+00 : f32
    %423 = vector.broadcast %cst_115 : f32 to vector<8x96xf32>
    %424 = arith.addf %423, %422 : vector<8x96xf32>
    %425 = arith.divf %423, %424 : vector<8x96xf32>
    %426 = vector.extract_strided_slice %425 {offsets = [0, 0], sizes = [8, 32], strides = [1, 1]} : vector<8x96xf32> to vector<8x32xf32>
    %427 = vector.extract_strided_slice %425 {offsets = [0, 32], sizes = [8, 32], strides = [1, 1]} : vector<8x96xf32> to vector<8x32xf32>
    %428 = vector.extract_strided_slice %425 {offsets = [0, 64], sizes = [8, 32], strides = [1, 1]} : vector<8x96xf32> to vector<8x32xf32>
    %429 = vector.extract_strided_slice %419 {offsets = [0, 96], sizes = [8, 32], strides = [1, 1]} : vector<8x128xf32> to vector<8x32xf32>
    %430 = math.tanh %429 : vector<8x32xf32>
    %431 = arith.mulf %427, %10 : vector<8x32xf32>
    %432 = arith.mulf %426, %430 : vector<8x32xf32>
    %433 = arith.addf %431, %432 : vector<8x32xf32>
    %434 = math.tanh %433 : vector<8x32xf32>
    %435 = arith.mulf %428, %434 : vector<8x32xf32>
    %436 = vector.broadcast %8 : i32 to vector<8x1xi32>
    %437 = arith.cmpi sgt, %9, %436 : vector<8x1xi32>
    %438 = arith.extui %437 : vector<8x1xi1> to vector<8x1xi32>
    %439 = arith.sitofp %438 : vector<8x1xi32> to vector<8x1xf32>
    %440 = vector.broadcast %439 : vector<8x1xf32> to vector<8x32xf32>
    %441 = arith.mulf %410, %440 : vector<8x32xf32>
    %442 = vector.broadcast %439 : vector<8x1xf32> to vector<8x32xf32>
    %443 = arith.mulf %435, %442 : vector<8x32xf32>
    %c0_116 = arith.constant 0 : index
    %c0_117 = arith.constant 0 : index
    %444 = vector.load %arg3[%c0_116, %c0_117] : memref<8x100xf32, #tpu.memory_space<vmem>>, vector<8x100xf32>
    %c0_118 = arith.constant 0 : index
    %c0_119 = arith.constant 0 : index
    %445 = vector.load %arg10[%c0_118, %c0_119] : memref<100x16xf32, #tpu.memory_space<vmem>>, vector<100x16xf32>
    %cst_120 = arith.constant dense<0.000000e+00> : vector<8x16xf32>
    %446 = tpu.matmul %444, %445, %cst_120 {dimension_numbers = #tpu.dot_dimension_numbers<[1], [0], [0], [1], [0, 0, 1, 1], [], []>} : vector<8x100xf32>, vector<100x16xf32>, vector<8x16xf32> -> vector<8x16xf32>
    %c0_121 = arith.constant 0 : index
    %c0_122 = arith.constant 0 : index
    %447 = vector.load %arg4[%c0_121, %c0_122] : memref<8x4xf32, #tpu.memory_space<vmem>>, vector<8x4xf32>
    %c0_123 = arith.constant 0 : index
    %c0_124 = arith.constant 0 : index
    %448 = vector.load %arg11[%c0_123, %c0_124] : memref<4x16xf32, #tpu.memory_space<vmem>>, vector<4x16xf32>
    %cst_125 = arith.constant dense<0.000000e+00> : vector<8x16xf32>
    %449 = tpu.matmul %447, %448, %cst_125 {dimension_numbers = #tpu.dot_dimension_numbers<[1], [0], [0], [1], [0, 0, 1, 1], [], []>} : vector<8x4xf32>, vector<4x16xf32>, vector<8x16xf32> -> vector<8x16xf32>
    %450 = arith.addf %446, %449 : vector<8x16xf32>
    %c0_126 = arith.constant 0 : index
    %c0_127 = arith.constant 0 : index
    %451 = vector.load %arg12[%c0_126, %c0_127] : memref<1x16xf32, #tpu.memory_space<vmem>>, vector<1x16xf32>
    %452 = vector.broadcast %451 : vector<1x16xf32> to vector<8x16xf32>
    %453 = arith.addf %450, %452 : vector<8x16xf32>
    %cst_128 = arith.constant 0.000000e+00 : f32
    %454 = vector.broadcast %cst_128 : f32 to vector<8x16xf32>
    %455 = arith.maximumf %453, %454 : vector<8x16xf32>
    %c0_129 = arith.constant 0 : index
    %c0_130 = arith.constant 0 : index
    %456 = vector.load %arg13[%c0_129, %c0_130] : memref<32x64xf32, #tpu.memory_space<vmem>>, vector<32x64xf32>
    %cst_131 = arith.constant dense<0.000000e+00> : vector<8x64xf32>
    %457 = tpu.matmul %441, %456, %cst_131 {dimension_numbers = #tpu.dot_dimension_numbers<[1], [0], [0], [1], [0, 0, 1, 1], [], []>} : vector<8x32xf32>, vector<32x64xf32>, vector<8x64xf32> -> vector<8x64xf32>
    %c0_132 = arith.constant 0 : index
    %c0_133 = arith.constant 0 : index
    %458 = vector.load %arg14[%c0_132, %c0_133] : memref<32x64xf32, #tpu.memory_space<vmem>>, vector<32x64xf32>
    %cst_134 = arith.constant dense<0.000000e+00> : vector<8x64xf32>
    %459 = tpu.matmul %443, %458, %cst_134 {dimension_numbers = #tpu.dot_dimension_numbers<[1], [0], [0], [1], [0, 0, 1, 1], [], []>} : vector<8x32xf32>, vector<32x64xf32>, vector<8x64xf32> -> vector<8x64xf32>
    %460 = arith.addf %457, %459 : vector<8x64xf32>
    %c0_135 = arith.constant 0 : index
    %c0_136 = arith.constant 0 : index
    %461 = vector.load %arg15[%c0_135, %c0_136] : memref<16x64xf32, #tpu.memory_space<vmem>>, vector<16x64xf32>
    %cst_137 = arith.constant dense<0.000000e+00> : vector<8x64xf32>
    %462 = tpu.matmul %455, %461, %cst_137 {dimension_numbers = #tpu.dot_dimension_numbers<[1], [0], [0], [1], [0, 0, 1, 1], [], []>} : vector<8x16xf32>, vector<16x64xf32>, vector<8x64xf32> -> vector<8x64xf32>
    %463 = arith.addf %460, %462 : vector<8x64xf32>
    %c0_138 = arith.constant 0 : index
    %c0_139 = arith.constant 0 : index
    %464 = vector.load %arg16[%c0_138, %c0_139] : memref<1x64xf32, #tpu.memory_space<vmem>>, vector<1x64xf32>
    %465 = vector.broadcast %464 : vector<1x64xf32> to vector<8x64xf32>
    %466 = arith.addf %463, %465 : vector<8x64xf32>
    %cst_140 = arith.constant 0.000000e+00 : f32
    %467 = vector.broadcast %cst_140 : f32 to vector<8x64xf32>
    %468 = arith.maximumf %466, %467 : vector<8x64xf32>
    %c0_141 = arith.constant 0 : index
    %c0_142 = arith.constant 0 : index
    %469 = vector.load %arg17[%c0_141, %c0_142] : memref<8x64xf32, #tpu.memory_space<vmem>>, vector<8x64xf32>
    tpu.vector_store %arg17[%c0_141, %c0_142], %468 {strides = array<i32>} : memref<8x64xf32, #tpu.memory_space<vmem>>, vector<8x64xf32>,
    return
  }
}

</mosaic_0001>

<bundles_post_ra>
// kernel: packet_encoder_forward.1
= control target key start
LH: loop header
LB: loop body
LE: loop exit
PB: predicated region body
PF: predicated region fallthrough
CT: control target
= control target key end

     0   :  { %v3330_v2 = vmov 0.0|0.0   ;;  %vm84_vm0 = vcmask 261120   ;;  %vm3331_vm1 = vmmov 0   ;;  %v3332_v4 = vmov 0.0   ;;  %s3333_s19 = smov 32   ;;  %s4012_s5 = inlined_call_operand.vmem [shape: f32[32,128], index: 5, kind: input, shape index: {}]   ;;  %s4013_s7 = inlined_call_operand.vmem [shape: f32[32,128], index: 7, kind: input, shape index: {}]   ;;  %s4014_s2 = inlined_call_operand.vmem [shape: f32[128,32], index: 2, kind: input, shape index: {}]   ;;  %s4015_s6 = inlined_call_operand.vmem [shape: f32[1,128], index: 6, kind: input, shape index: {}]   ;;  %s4016_s0 = inlined_call_operand.<no memory space> [shape: s32[1], index: 0, kind: input, shape index: {}]   ;;  %s4017_s8 = inlined_call_operand.vmem [shape: f32[32,128], index: 8, kind: input, shape index: {}]   ;;  %s4018_s9 = inlined_call_operand.vmem [shape: f32[1,128], index: 9, kind: input, shape index: {}]   ;;  %s4019_s1 = inlined_call_operand.vmem [shape: s32[8,1], index: 1, kind: input, shape index: {}]   ;;  %s4020_s11 = inlined_call_operand.vmem [shape: f32[4,16], index: 11, kind: input, shape index: {}]   ;;  %s4021_s4 = inlined_call_operand.vmem [shape: f32[8,4], index: 4, kind: input, shape index: {}]   ;;  %s4022_s10 = inlined_call_operand.vmem [shape: f32[100,16], index: 10, kind: input, shape index: {}]   ;;  %s4023_s3 = inlined_call_operand.vmem [shape: f32[8,100], index: 3, kind: input, shape index: {}]   ;;  %s4024_s14 = inlined_call_operand.vmem [shape: f32[32,64], index: 14, kind: input, shape index: {}]   ;;  %s4025_s13 = inlined_call_operand.vmem [shape: f32[32,64], index: 13, kind: input, shape index: {}]   ;;  %s4026_s15 = inlined_call_operand.vmem [shape: f32[16,64], index: 15, kind: input, shape index: {}]   ;;  %s4027_s12 = inlined_call_operand.vmem [shape: f32[1,16], index: 12, kind: input, shape index: {}]   ;;  %s4028_s16 = inlined_call_operand.vmem [shape: f32[1,64], index: 16, kind: input, shape index: {}]   ;;  %s4029_s17 = inlined_call_operand.vmem [shape: f32[8,64], index: 17, kind: output, shape index: {}]  }
   0x1   :  { %4032 = sst [smem:[#allocation4_spill]] %s4012_s5  ;;  %3051 = vmatprep.subr.bf16.mxu1 %v3330_v2  ;;  %2801 = vmatprep.mubr.msk.f32.mxu1 %vm3331_vm1, %v3332_v4  ;;  %v57_v11 = vld [vmem:[%s4014_s2] sm:$0xff]  ;;  %v58_v15 = vld [vmem:[%s4014_s2 + $0x8] sm:$0xff]  ;;  %v59_v51 = vld [vmem:[%s4014_s2 + $0x10] sm:$0xff]  ;;  %s3513_s27 = sadd.s32 4294967295, %s4016_s0 }
   0x2   :  { %4033 = sst [smem:[#allocation5_spill]] %s4013_s7  ;;  %s4034_s26 = sld [smem:[#allocation4_spill]]  ;;  %2769 = vmatprep.mubr.msk.f32.mxu0 %vm84_vm0, %v57_v11  ;;  %v3484_v16 = vld [vmem:[%s4015_s6] ss:$0 sm:$0xff]  ;;  %v60_v52 = vld [vmem:[%s4014_s2 + $0x18] sm:$0xff] }
   0x3   :  { %s4035_s30 = sld [smem:[#allocation5_spill]]  ;;  %s3334_s7 = smov 64  }
   0x4   :  { %p400_p0 = scmp.eq.s32.totalorder %s3513_s27, 0  ;;  %p507_p1 = scmp.eq.s32.totalorder %s3513_s27, 1 }
   0x5   :  { %p614_p2 = scmp.eq.s32.totalorder %s3513_s27, 2  ;;  %p721_p3 = scmp.eq.s32.totalorder %s3513_s27, 3 }
   0x6   :  { %s401_s28 = scalar_select %p400_p0, 1, 0 }
   0x7   :  { %s508_s29 = scalar_select %p507_p1, 1, 0 }
   0x8   :  { %v73_v0 = vld [vmem:[%s4034_s26] sm:$0xff]  ;;  %v74_v1 = vld [vmem:[%s4034_s26 + $0x8] sm:$0xff]  ;;  %v75_v7 = vld [vmem:[%s4034_s26 + $0x10] sm:$0xff]  ;;  %v402_v54 = vstv %s401_s28  ;;  %s615_s0 = scalar_select %p614_p2, 1, 0 }
   0x9   :  { %v298_v3 = vld [vmem:[%s4035_s30] sm:$0xff]  ;;  %v3043_v5 = vpack.c.bf16 %v74_v1, %v73_v0  ;;  %v299_v6 = vld [vmem:[%s4035_s30 + $0x8] sm:$0xff]  ;;  %v76_v8 = vld [vmem:[%s4034_s26 + $0x18] sm:$0xff]  ;;  %v509_v55 = vstv %s508_s29  ;;  %vm403_vm2 = vcmp.eq.s32.totalorder %v402_v54, 1  ;;  %s722_s29 = scalar_select %p721_p3, 1, 0 }
   0xa   :  { %v3447_v9 = vpack.c.bf16 %v299_v6, %v298_v3  ;;  %v3047_v10 = vpack.c.bf16 %v76_v8, %v75_v7  ;;  %v300_v12 = vld [vmem:[%s4035_s30 + $0x10] sm:$0xff]  ;;  %v301_v13 = vld [vmem:[%s4035_s30 + $0x18] sm:$0xff]  ;;  %vm510_vm3 = vcmp.eq.s32.totalorder %v509_v55, 1  ;;  %p828_p4 = scmp.eq.s32.totalorder %s3513_s27, 4  ;;  %p935_p5 = scmp.eq.s32.totalorder %s3513_s27, 5 }
   0xb   :  { %3044 = vmatprep.subr.bf16.mxu0 %v3043_v5  ;;  %v3460_v14 = vpack.c.bf16 %v301_v13, %v300_v12  ;;  %p1042_p6 = scmp.eq.s32.totalorder %s3513_s27, 6  ;;  %p1149_p7 = scmp.eq.s32.totalorder %s3513_s27, 7 }
   0xc   :  { %3046 = vmatpush3.bf16.msra.mxu0 %v3043_v5  ;;  %3053 = vmatpush3.bf16.msra.mxu1 %v3447_v9  ;;  %s936_s26 = scalar_select %p935_p5, 1, 0 }
   0xd   :  { %3048 = vmatprep.subr.bf16.mxu0 %v3047_v10  ;;  %3054 = vmatprep.subr.bf16.mxu1 %v3330_v2  ;;  %s1043_s5 = scalar_select %p1042_p6, 1, 0 }
   0xe   :  { %s1150_s30 = scalar_select %p1149_p7, 1, 0 }
   0xf   :  { %p1256_p8 = scmp.eq.s32.totalorder %s3513_s27, 8  ;;  %p1363_p9 = scmp.eq.s32.totalorder %s3513_s27, 9 }
  0x10   :  { %3050 = vmatpush3.bf16.msra.mxu0 %v3047_v10  ;;  %3056 = vmatpush3.bf16.msra.mxu1 %v3460_v14  ;;  %p1470_p10 = scmp.eq.s32.totalorder %s3513_s27, 10  ;;  %p1577_p11 = scmp.eq.s32.totalorder %s3513_s27, 11 }
  0x11   :  { %3057 = vmatprep.subr.bf16.mxu1 %v3330_v2  ;;  %3075 = vmatprep.subr.bf16.mxu0 %v3330_v2  ;;  %s1257_s18 = scalar_select %p1256_p8, 1, 0 }
  0x12   :  { %s1364_s20 = scalar_select %p1363_p9, 1, 0 }
  0x13   :  { %2770 = vmatmul.mubr.msk.f32.vlgmr.msra.gmra.mrb[0].mxu0 %vm84_vm0, %v58_v15  ;;  %2802 = vmatmul.mubr.f32.vlgmr.msra.gmra.mrb[0].mxu1 %v3332_v4  ;;  %s1471_s21 = scalar_select %p1470_p10, 1, 0 }
  0x14   :  { %3059 = vmatpush3.bf16.msra.mxu1 %v3447_v9  ;;  %2812 = vmatprep.mubr.msk.f32.mxu1 %vm3331_vm1, %v3332_v4  ;;  %s1578_s22 = scalar_select %p1577_p11, 1, 0 }
  0x15   :  { %3060 = vmatprep.subr.bf16.mxu1 %v3330_v2  ;;  %3077 = vmatpush3.bf16.msra.mxu0 %v3447_v9  ;;  %p1684_p12 = scmp.eq.s32.totalorder %s3513_s27, 12  ;;  %p1791_p13 = scmp.eq.s32.totalorder %s3513_s27, 13 }
  0x16   :  { %3078 = vmatprep.subr.bf16.mxu0 %v3330_v2  ;;  %2772 = vmatprep.mubr.msk.f32.mxu0 %vm84_vm0, %v59_v51  ;;  %v72_v51 = vld [vmem:[%s4014_s2 + $0x78] sm:$0xff]  ;;  %p1898_p0 = scmp.eq.s32.totalorder %s3513_s27, 14  ;;  %p2005_p1 = scmp.eq.s32.totalorder %s3513_s27, 15 }
  0x17   :  { %2773 = vmatmul.mubr.msk.f32.gmra.mrb[2].mxu0 %vm84_vm0, %v60_v52  ;;  %v723_v52 = vstv %s722_s29  ;;  %s1685_s23 = scalar_select %p1684_p12, 1, 0 }
  0x18   :  { %3062 = vmatpush3.bf16.msra.mxu1 %v3460_v14  ;;  %vm724_vm5 = vcmp.eq.s32.totalorder %v723_v52, 1  ;;  %s1899_s25 = scalar_select %p1898_p0, 1, 0 }
  0x19   :  { %3063 = vmatprep.subr.bf16.mxu1 %v3330_v2  ;;  %3080 = vmatpush3.bf16.msra.mxu0 %v3460_v14  ;;  %s2006_s29 = scalar_select %p2005_p1, 1, 0 }
  0x1a   :  { %3087 = vmatprep.subr.bf16.mxu0 %v3330_v2 }
  0xe6   :  { %v2771_v17 = vpop.f32.mrb[0].mxu0  ;;  %v371_v18 = vpop.f32.mrb[0].mxu1 }
  0xe7   :  { %v199_v19 = vpop.f32.mrb[1].mxu0  ;;  %v2803_v20 = vpop.f32.mrb[1].mxu1  ;;  %v205_v37 = vadd.f32 %v2771_v17, %v3484_v16 }
  0xe8   :  { %v200_v21 = vadd.f32 %v3484_v16, %v199_v19  ;;  %v616_v19 = vstv %s615_s0  ;;  %s829_s0 = scalar_select %p828_p4, 1, 0 }
  0xe9   :  { %vm3532_vm4 = vcmp.eq.s32.totalorder %v616_v19, 1 }
  0xea   :  { %v375_v22 = vadd.f32 %v371_v18, %v200_v21  ;;  %v2774_v60 = vpop.f32.mrb[2].mxu0 }
  0xeb   :  { %v209_v61 = vpop.f32.mrb[3].mxu0 }
  0xec   :  { %3193 = vtanh.f32 %v375_v22  ;;  %v2582_v24 = vmul.f32 -1.442695, %v375_v22  ;;  %v210_v63 = vadd.f32 %v3484_v16, %v209_v61 }
  0xee   :  { %3195 = vpow2.f32 %v2582_v24 }
  0xf6   :  { %v3194_v23 = vpop.eup %3193 }
  0xf7   :  { %385 = vrot.lane.b32.xlu0 %v3194_v23, %s3333_s19 }
  0xf8   :  { %v3196_v25 = vpop.eup %3195 }
  0xf9   :  { %v379_v26 = vadd.f32 1.0, %v3196_v25  ;;  %v215_v25 = vadd.f32 %v2774_v60, %v3484_v16 }
  0xfb   :  { %3197 = vrcp.f32 %v379_v26 }
 0x105   :  { %v3198_v27 = vpop.eup %3197 }
 0x106   :  { %v383_v30 = vmul.f32 0.0, %v3198_v27 }
 0x169   :  { %v386_v28 = vpop.permute.xlu0 %385 }
 0x16a   :  { %v388_v29 = vmul.f32 %v3198_v27, %v386_v28 }
 0x16c   :  { %390 = vrot.lane.b32.xlu0 %v388_v29, %s3333_s19 }
 0x1de   :  { %v391_v31 = vpop.permute.xlu0 %390 }
 0x1df   :  { %v393_v32 = vadd.f32 %v391_v31, %v383_v30 }
 0x1e1   :  { %3199 = vtanh.f32 %v393_v32 }
 0x1eb   :  { %v3200_v33 = vpop.eup %3199 }
 0x1ec   :  { %396 = vrot.lane.b32.xlu1 %v3200_v33, %s3333_s19 }
 0x25e   :  { %v397_v34 = vpop.permute.xlu1 %396 }
 0x25f   :  { %v399_v35 = vmul.f32 %v3198_v27, %v397_v34 }
 0x261   :  { %408 = vrot.lane.b32.xlu1 %v399_v35, %s3334_s7  ;;  %v404_v58 = vsel %vm403_vm2, %v399_v35, 0.0 }
 0x2d3   :  { %v409_v36 = vpop.permute.xlu1 %408 }
 0x2d4   :  { %2813 = vmatmul.mubr.msk.f32.vlgmr.msra.gmra.mrb[2].mxu1 %vm84_vm0, %v409_v36 }
 0x2d5   :  { %3065 = vmatpush3.bf16.msra.mxu1 %v3447_v9  ;;  %2823 = vmatprep.mubr.msk.f32.mxu1 %vm3331_vm1, %v3332_v4 }
 0x2d6   :  { %3066 = vmatprep.subr.bf16.mxu1 %v3330_v2 }
 0x2d9   :  { %3068 = vmatpush3.bf16.msra.mxu1 %v3460_v14 }
 0x2da   :  { %3069 = vmatprep.subr.bf16.mxu1 %v3330_v2 }
 0x3a7   :  { %v478_v38 = vpop.f32.mrb[2].mxu1 }
 0x3a8   :  { %v482_v39 = vadd.f32 %v478_v38, %v205_v37  ;;  %v2814_v40 = vpop.f32.mrb[3].mxu1 }
 0x3a9   :  { %v62_v40 = vld [vmem:[%s4014_s2 + $0x28] sm:$0xff] }
 0x3aa   :  { %3201 = vtanh.f32 %v482_v39  ;;  %v2584_v42 = vmul.f32 -1.442695, %v482_v39  ;;  %v61_v39 = vld [vmem:[%s4014_s2 + $0x20] sm:$0xff] }
 0x3ab   :  { %2775 = vmatprep.mubr.msk.f32.mxu0 %vm84_vm0, %v61_v39 }
 0x3ac   :  { %3203 = vpow2.f32 %v2584_v42  ;;  %2776 = vmatmul.mubr.msk.f32.gmra.mrb[4].mxu0 %vm84_vm0, %v62_v40  ;;  %v64_v42 = vld [vmem:[%s4014_s2 + $0x38] sm:$0xff] }
 0x3b4   :  { %v3202_v41 = vpop.eup %3201 }
 0x3b5   :  { %492 = vrot.lane.b32.xlu0 %v3202_v41, %s3333_s19  ;;  %v63_v41 = vld [vmem:[%s4014_s2 + $0x30] sm:$0xff] }
 0x3b6   :  { %v3204_v43 = vpop.eup %3203  ;;  %2778 = vmatprep.mubr.msk.f32.mxu0 %vm84_vm0, %v63_v41 }
 0x3b7   :  { %v486_v44 = vadd.f32 1.0, %v3204_v43  ;;  %v65_v43 = vld [vmem:[%s4014_s2 + $0x40] sm:$0xff]  ;;  %2779 = vmatmul.mubr.msk.f32.gmra.mrb[6].mxu0 %vm84_vm0, %v64_v42 }
 0x3b8   :  { %2781 = vmatprep.mubr.msk.f32.mxu0 %vm84_vm0, %v65_v43 }
 0x3b9   :  { %3205 = vrcp.f32 %v486_v44  ;;  %v66_v44 = vld [vmem:[%s4014_s2 + $0x48] sm:$0xff] }
 0x3bb   :  { %2782 = vmatmul.mubr.msk.f32.gmra.mrb[8].mxu0 %vm84_vm0, %v66_v44 }
 0x3c3   :  { %v3206_v45 = vpop.eup %3205 }
 0x3c4   :  { %v490_v48 = vmul.f32 %v3206_v45, %v393_v32 }
 0x427   :  { %v493_v46 = vpop.permute.xlu0 %492 }
 0x428   :  { %v495_v47 = vmul.f32 %v3206_v45, %v493_v46 }
 0x42a   :  { %497 = vrot.lane.b32.xlu1 %v495_v47, %s3333_s19  ;;  %v68_v47 = vld [vmem:[%s4014_s2 + $0x58] sm:$0xff] }
 0x49c   :  { %v498_v49 = vpop.permute.xlu1 %497 }
 0x49d   :  { %v500_v50 = vadd.f32 %v498_v49, %v490_v48  ;;  %v69_v48 = vld [vmem:[%s4014_s2 + $0x60] sm:$0xff]  ;;  %v70_v49 = vld [vmem:[%s4014_s2 + $0x68] sm:$0xff] }
 0x49f   :  { %3207 = vtanh.f32 %v500_v50 }
 0x4a9   :  { %v3208_v53 = vpop.eup %3207 }
 0x4aa   :  { %503 = vrot.lane.b32.xlu0 %v3208_v53, %s3333_s19 }
 0x51c   :  { %v504_v56 = vpop.permute.xlu0 %503 }
 0x51d   :  { %v506_v57 = vmul.f32 %v3206_v45, %v504_v56  ;;  %v67_v45 = vld [vmem:[%s4014_s2 + $0x50] sm:$0xff]  ;;  %v2777_v56 = vpop.f32.mrb[4].mxu0 }
 0x51e   :  { %2784 = vmatprep.mubr.msk.f32.mxu0 %vm84_vm0, %v67_v45 }
 0x51f   :  { %v3517_v59 = vsel %vm510_vm3, %v506_v57, %v404_v58  ;;  %515 = vrot.lane.b32.xlu1 %v506_v57, %s3334_s7  ;;  %2785 = vmatmul.mubr.msk.f32.gmra.mrb[10].mxu0 %vm84_vm0, %v68_v47  ;;  %v219_v57 = vpop.f32.mrb[5].mxu0 }
 0x520   :  { %2787 = vmatprep.mubr.msk.f32.mxu0 %vm84_vm0, %v69_v48  ;;  %v3617_v58 = vpop.f32.mrb[6].mxu0 }
 0x521   :  { %v3619_v60 = vpop.f32.mrb[7].mxu0 }
 0x522   :  { %v3621_v61 = vpop.f32.mrb[8].mxu0 }
 0x523   :  { %2788 = vmatmul.mubr.msk.f32.gmra.mrb[12].mxu0 %vm84_vm0, %v70_v49 }
 0x591   :  { %v516_v62 = vpop.permute.xlu1 %515 }
 0x592   :  { %2824 = vmatmul.mubr.msk.f32.vlgmr.msra.gmra.mrb[4].mxu1 %vm84_vm0, %v516_v62  ;;  %v3623_v62 = vpop.f32.mrb[9].mxu0 }
 0x593   :  { %3071 = vmatpush3.bf16.msra.mxu1 %v3447_v9  ;;  %2834 = vmatprep.mubr.msk.f32.mxu1 %vm3331_vm1, %v3332_v4 }
 0x594   :  { %3072 = vmatprep.subr.bf16.mxu1 %v3330_v2 }
 0x597   :  { %3074 = vmatpush3.bf16.msra.mxu1 %v3460_v14 }
 0x598   :  { %3081 = vmatprep.subr.bf16.mxu1 %v3330_v2 }
 0x665   :  { %v585_v0 = vpop.f32.mrb[4].mxu1 }
 0x666   :  { %v589_v1 = vadd.f32 %v585_v0, %v210_v63  ;;  %v2825_v3 = vpop.f32.mrb[5].mxu1  ;;  %v3625_v63 = vpop.f32.mrb[10].mxu0 }
 0x667   :  { %v3627_v0 = vpop.f32.mrb[11].mxu0 }
 0x668   :  { %3209 = vtanh.f32 %v589_v1  ;;  %v2586_v6 = vmul.f32 -1.442695, %v589_v1  ;;  %v3629_v1 = vpop.f32.mrb[12].mxu0 }
 0x66a   :  { %3211 = vpow2.f32 %v2586_v6 }
 0x672   :  { %v3210_v5 = vpop.eup %3209 }
 0x673   :  { %599 = vrot.lane.b32.xlu0 %v3210_v5, %s3333_s19 }
 0x674   :  { %v3212_v7 = vpop.eup %3211 }
 0x675   :  { %v593_v8 = vadd.f32 1.0, %v3212_v7  ;;  %v220_v7 = vadd.f32 %v3484_v16, %v219_v57 }
 0x677   :  { %3213 = vrcp.f32 %v593_v8 }
 0x681   :  { %v3214_v10 = vpop.eup %3213 }
 0x682   :  { %v597_v13 = vmul.f32 %v3214_v10, %v500_v50  ;;  %v71_v50 = vld [vmem:[%s4014_s2 + $0x70] sm:$0xff] }
 0x683   :  { %2790 = vmatprep.mubr.msk.f32.mxu0 %vm84_vm0, %v71_v50 }
 0x684   :  { %2791 = vmatmul.mubr.msk.f32.gmra.mrb[14].mxu0 %vm84_vm0, %v72_v51  ;;  %v230_v51 = vadd.f32 %v3484_v16, %v3619_v60 }
 0x685   :  { %2845 = vmatprep.mubr.msk.f32.mxu0 %vm3331_vm1, %v3332_v4 }
 0x6e5   :  { %v600_v11 = vpop.permute.xlu0 %599 }
 0x6e6   :  { %v602_v12 = vmul.f32 %v3214_v10, %v600_v11 }
 0x6e8   :  { %604 = vrot.lane.b32.xlu1 %v602_v12, %s3333_s19 }
 0x75a   :  { %v605_v15 = vpop.permute.xlu1 %604 }
 0x75b   :  { %v607_v17 = vadd.f32 %v605_v15, %v597_v13 }
 0x75d   :  { %3215 = vtanh.f32 %v607_v17 }
 0x767   :  { %v3216_v18 = vpop.eup %3215 }
 0x768   :  { %610 = vrot.lane.b32.xlu0 %v3216_v18, %s3333_s19 }
 0x7da   :  { %v611_v20 = vpop.permute.xlu0 %610 }
 0x7db   :  { %v3536_v22 = vmul.f32 %v3214_v10, %v611_v20 }
 0x7dd   :  { %v618_v23 = vsel %vm3532_vm4, %v3536_v22, %v3517_v59  ;;  %622 = vrot.lane.b32.xlu1 %v3536_v22, %s3334_s7  ;;  %v3631_v59 = vpop.f32.mrb[13].mxu0  ;;  %vm2152_vm4 = vcmask 1043456  }
 0x7de   :  { %v3633_v3 = vpop.f32.mrb[14].mxu0 }
 0x7df   :  { %v3635_v5 = vpop.f32.mrb[15].mxu0 }
 0x84f   :  { %v623_v24 = vpop.permute.xlu1 %622 }
 0x850   :  { %2835 = vmatmul.mubr.msk.f32.vlgmr.msra.gmra.mrb[6].mxu1 %vm84_vm0, %v623_v24 }
 0x851   :  { %3083 = vmatpush3.bf16.msra.mxu1 %v3447_v9  ;;  %2856 = vmatprep.mubr.msk.f32.mxu1 %vm3331_vm1, %v3332_v4 }
 0x852   :  { %3084 = vmatprep.subr.bf16.mxu1 %v3330_v2 }
 0x855   :  { %3086 = vmatpush3.bf16.msra.mxu1 %v3460_v14 }
 0x856   :  { %3093 = vmatprep.subr.bf16.mxu1 %v3330_v2 }
 0x923   :  { %v692_v26 = vpop.f32.mrb[6].mxu1 }
 0x924   :  { %v696_v27 = vadd.f32 %v692_v26, %v215_v25  ;;  %v2836_v28 = vpop.f32.mrb[7].mxu1  ;;  %v830_v25 = vstv %s829_s0 }
 0x925   :  { %vm3650_vm6 = vcmp.eq.s32.totalorder %v830_v25, 1 }
 0x926   :  { %3217 = vtanh.f32 %v696_v27  ;;  %v2588_v30 = vmul.f32 -1.442695, %v696_v27 }
 0x928   :  { %3219 = vpow2.f32 %v2588_v30 }
 0x930   :  { %v3218_v29 = vpop.eup %3217 }
 0x931   :  { %706 = vrot.lane.b32.xlu0 %v3218_v29, %s3333_s19 }
 0x932   :  { %v3220_v31 = vpop.eup %3219 }
 0x933   :  { %v700_v32 = vadd.f32 1.0, %v3220_v31  ;;  %v225_v31 = vadd.f32 %v2777_v56, %v3484_v16 }
 0x935   :  { %3221 = vrcp.f32 %v700_v32 }
 0x93f   :  { %v3222_v33 = vpop.eup %3221 }
 0x940   :  { %v704_v36 = vmul.f32 %v3222_v33, %v607_v17 }
 0x9a3   :  { %v707_v34 = vpop.permute.xlu0 %706 }
 0x9a4   :  { %v709_v35 = vmul.f32 %v3222_v33, %v707_v34 }
 0x9a6   :  { %711 = vrot.lane.b32.xlu1 %v709_v35, %s3333_s19 }
 0xa18   :  { %v712_v37 = vpop.permute.xlu1 %711 }
 0xa19   :  { %v3554_v38 = vadd.f32 %v712_v37, %v704_v36 }
 0xa1b   :  { %3223 = vtanh.f32 %v3554_v38 }
 0xa25   :  { %v3224_v46 = vpop.eup %3223 }
 0xa26   :  { %717 = vrot.lane.b32.xlu0 %v3224_v46, %s3333_s19  ;;  %v937_v46 = vstv %s936_s26 }
 0xa27   :  { %vm938_vm7 = vcmp.eq.s32.totalorder %v937_v46, 1 }
 0xa98   :  { %v718_v53 = vpop.permute.xlu0 %717 }
 0xa99   :  { %v720_v54 = vmul.f32 %v3222_v33, %v718_v53 }
 0xa9b   :  { %v3614_v55 = vsel %vm724_vm5, %v720_v54, %v618_v23  ;;  %729 = vrot.lane.b32.xlu1 %v720_v54, %s3334_s7  ;;  %vm2148_vm5 = vcmask 31744  }
 0xb0d   :  { %v730_v6 = vpop.permute.xlu1 %729 }
 0xb0e   :  { %2846 = vmatmul.mubr.msk.f32.vlgmr.msra.gmra.mrb[16].mxu0 %vm84_vm0, %v730_v6 }
 0xb0f   :  { %3089 = vmatpush3.bf16.msra.mxu0 %v3447_v9  ;;  %2867 = vmatprep.mubr.msk.f32.mxu0 %vm3331_vm1, %v3332_v4 }
 0xb10   :  { %3090 = vmatprep.subr.bf16.mxu0 %v3330_v2 }
 0xb13   :  { %3092 = vmatpush3.bf16.msra.mxu0 %v3460_v14 }
 0xb14   :  { %3099 = vmatprep.subr.bf16.mxu0 %v3330_v2 }
 0xbe1   :  { %v799_v8 = vpop.f32.mrb[16].mxu0 }
 0xbe2   :  { %v803_v10 = vadd.f32 %v799_v8, %v220_v7  ;;  %v2847_v11 = vpop.f32.mrb[17].mxu0 }
 0xbe4   :  { %3225 = vtanh.f32 %v803_v10  ;;  %v2590_v13 = vmul.f32 -1.442695, %v803_v10 }
 0xbe6   :  { %3227 = vpow2.f32 %v2590_v13 }
 0xbee   :  { %v3226_v12 = vpop.eup %3225 }
 0xbef   :  { %813 = vrot.lane.b32.xlu0 %v3226_v12, %s3333_s19 }
 0xbf0   :  { %v3228_v15 = vpop.eup %3227 }
 0xbf1   :  { %v807_v17 = vadd.f32 1.0, %v3228_v15  ;;  %v1044_v15 = vstv %s1043_s5 }
 0xbf2   :  { %vm3686_vm8 = vcmp.eq.s32.totalorder %v1044_v15, 1 }
 0xbf3   :  { %3229 = vrcp.f32 %v807_v17 }
 0xbfd   :  { %v3230_v18 = vpop.eup %3229 }
 0xbfe   :  { %v811_v21 = vmul.f32 %v3230_v18, %v3554_v38 }
 0xc61   :  { %v814_v19 = vpop.permute.xlu0 %813 }
 0xc62   :  { %v816_v20 = vmul.f32 %v3230_v18, %v814_v19 }
 0xc64   :  { %818 = vrot.lane.b32.xlu1 %v816_v20, %s3333_s19 }
 0xcd6   :  { %v819_v22 = vpop.permute.xlu1 %818 }
 0xcd7   :  { %v821_v23 = vadd.f32 %v819_v22, %v811_v21  ;;  %v235_v22 = vadd.f32 %v3617_v58, %v3484_v16 }
 0xcd9   :  { %3231 = vtanh.f32 %v821_v23 }
 0xce3   :  { %v3232_v24 = vpop.eup %3231 }
 0xce4   :  { %824 = vrot.lane.b32.xlu0 %v3232_v24, %s3333_s19 }
 0xd56   :  { %v825_v26 = vpop.permute.xlu0 %824 }
 0xd57   :  { %v827_v28 = vmul.f32 %v3230_v18, %v825_v26 }
 0xd59   :  { %v832_v29 = vsel %vm3650_vm6, %v827_v28, %v3614_v55  ;;  %836 = vrot.lane.b32.xlu1 %v827_v28, %s3334_s7  ;;  %vm2226_vm6 = vcmask 818176  }
 0xdcb   :  { %v837_v30 = vpop.permute.xlu1 %836 }
 0xdcc   :  { %2857 = vmatmul.mubr.msk.f32.vlgmr.msra.gmra.mrb[8].mxu1 %vm84_vm0, %v837_v30 }
 0xdcd   :  { %3095 = vmatpush3.bf16.msra.mxu1 %v3447_v9  ;;  %2878 = vmatprep.mubr.msk.f32.mxu1 %vm3331_vm1, %v3332_v4 }
 0xdce   :  { %3096 = vmatprep.subr.bf16.mxu1 %v3330_v2 }
 0xdd1   :  { %3098 = vmatpush3.bf16.msra.mxu1 %v3460_v14 }
 0xdd2   :  { %3105 = vmatprep.subr.bf16.mxu1 %v3330_v2 }
 0xe9f   :  { %v906_v32 = vpop.f32.mrb[8].mxu1 }
 0xea0   :  { %v910_v33 = vadd.f32 %v906_v32, %v225_v31  ;;  %v2858_v34 = vpop.f32.mrb[9].mxu1 }
 0xea2   :  { %3233 = vtanh.f32 %v910_v33  ;;  %v2592_v36 = vmul.f32 -1.442695, %v910_v33 }
 0xea4   :  { %3235 = vpow2.f32 %v2592_v36  ;;  %v1151_v36 = vstv %s1150_s30 }
 0xea5   :  { %vm1152_vm9 = vcmp.eq.s32.totalorder %v1151_v36, 1 }
 0xeac   :  { %v3234_v35 = vpop.eup %3233 }
 0xead   :  { %920 = vrot.lane.b32.xlu0 %v3234_v35, %s3333_s19 }
 0xeae   :  { %v3236_v37 = vpop.eup %3235 }
 0xeaf   :  { %v914_v38 = vadd.f32 1.0, %v3236_v37 }
 0xeb1   :  { %3237 = vrcp.f32 %v914_v38 }
 0xebb   :  { %v3238_v39 = vpop.eup %3237 }
 0xebc   :  { %v918_v42 = vmul.f32 %v3238_v39, %v821_v23 }
 0xf1f   :  { %v921_v40 = vpop.permute.xlu0 %920 }
 0xf20   :  { %v923_v41 = vmul.f32 %v3238_v39, %v921_v40 }
 0xf22   :  { %925 = vrot.lane.b32.xlu1 %v923_v41, %s3333_s19  ;;  %v240_v41 = vadd.f32 %v3484_v16, %v3623_v62 }
 0xf94   :  { %v926_v43 = vpop.permute.xlu1 %925 }
 0xf95   :  { %v928_v44 = vadd.f32 %v926_v43, %v918_v42 }
 0xf97   :  { %3239 = vtanh.f32 %v928_v44 }
 0xfa1   :  { %v3240_v45 = vpop.eup %3239 }
 0xfa2   :  { %931 = vrot.lane.b32.xlu0 %v3240_v45, %s3333_s19 }
0x1014   :  { %v932_v47 = vpop.permute.xlu0 %931 }
0x1015   :  { %v934_v48 = vmul.f32 %v3238_v39, %v932_v47 }
0x1017   :  { %v3670_v49 = vsel %vm938_vm7, %v934_v48, %v832_v29  ;;  %943 = vrot.lane.b32.xlu1 %v934_v48, %s3334_s7 }
0x1089   :  { %v944_v50 = vpop.permute.xlu1 %943 }
0x108a   :  { %2868 = vmatmul.mubr.msk.f32.vlgmr.msra.gmra.mrb[18].mxu0 %vm84_vm0, %v944_v50 }
0x108b   :  { %3101 = vmatpush3.bf16.msra.mxu0 %v3447_v9  ;;  %2889 = vmatprep.mubr.msk.f32.mxu0 %vm3331_vm1, %v3332_v4 }
0x108c   :  { %3102 = vmatprep.subr.bf16.mxu0 %v3330_v2 }
0x108f   :  { %3104 = vmatpush3.bf16.msra.mxu0 %v3460_v14 }
0x1090   :  { %3111 = vmatprep.subr.bf16.mxu0 %v3330_v2 }
0x115d   :  { %v1013_v52 = vpop.f32.mrb[18].mxu0 }
0x115e   :  { %v1017_v53 = vadd.f32 %v1013_v52, %v230_v51  ;;  %v2869_v54 = vpop.f32.mrb[19].mxu0 }
0x1160   :  { %3241 = vtanh.f32 %v1017_v53  ;;  %v2594_v56 = vmul.f32 -1.442695, %v1017_v53 }
0x1162   :  { %3243 = vpow2.f32 %v2594_v56 }
0x116a   :  { %v3242_v55 = vpop.eup %3241 }
0x116b   :  { %1027 = vrot.lane.b32.xlu0 %v3242_v55, %s3333_s19  ;;  %v1258_v55 = vstv %s1257_s18 }
0x116c   :  { %v3244_v57 = vpop.eup %3243  ;;  %vm3723_vm10 = vcmp.eq.s32.totalorder %v1258_v55, 1 }
0x116d   :  { %v1021_v6 = vadd.f32 1.0, %v3244_v57 }
0x116f   :  { %3245 = vrcp.f32 %v1021_v6 }
0x1179   :  { %v3246_v7 = vpop.eup %3245 }
0x117a   :  { %v1025_v11 = vmul.f32 %v3246_v7, %v928_v44 }
0x11dd   :  { %v1028_v8 = vpop.permute.xlu0 %1027 }
0x11de   :  { %v1030_v10 = vmul.f32 %v3246_v7, %v1028_v8 }
0x11e0   :  { %1032 = vrot.lane.b32.xlu1 %v1030_v10, %s3333_s19  ;;  %v245_v10 = vadd.f32 %v3621_v61, %v3484_v16 }
0x1252   :  { %v1033_v60 = vpop.permute.xlu1 %1032 }
0x1253   :  { %v1035_v12 = vadd.f32 %v1033_v60, %v1025_v11 }
0x1255   :  { %3247 = vtanh.f32 %v1035_v12 }
0x125f   :  { %v3248_v13 = vpop.eup %3247 }
0x1260   :  { %1038 = vrot.lane.b32.xlu0 %v3248_v13, %s3333_s19 }
0x12d2   :  { %v1039_v17 = vpop.permute.xlu0 %1038 }
0x12d3   :  { %v1041_v19 = vmul.f32 %v3246_v7, %v1039_v17 }
0x12d5   :  { %v1046_v20 = vsel %vm3686_vm8, %v1041_v19, %v3670_v49  ;;  %1050 = vrot.lane.b32.xlu1 %v1041_v19, %s3334_s7  ;;  %vm2472_vm8 = vcmask 130048  }
0x1347   :  { %v1051_v21 = vpop.permute.xlu1 %1050 }
0x1348   :  { %2879 = vmatmul.mubr.msk.f32.vlgmr.msra.gmra.mrb[10].mxu1 %vm84_vm0, %v1051_v21 }
0x1349   :  { %3107 = vmatpush3.bf16.msra.mxu1 %v3447_v9  ;;  %2900 = vmatprep.mubr.msk.f32.mxu1 %vm3331_vm1, %v3332_v4 }
0x134a   :  { %3108 = vmatprep.subr.bf16.mxu1 %v3330_v2 }
0x134d   :  { %3110 = vmatpush3.bf16.msra.mxu1 %v3460_v14 }
0x134e   :  { %3117 = vmatprep.subr.bf16.mxu1 %v3330_v2 }
0x141b   :  { %v1120_v23 = vpop.f32.mrb[10].mxu1 }
0x141c   :  { %v1124_v24 = vadd.f32 %v1120_v23, %v235_v22  ;;  %v2880_v25 = vpop.f32.mrb[11].mxu1 }
0x141d   :  { %v1365_v25 = vstv %s1364_s20 }
0x141e   :  { %3249 = vtanh.f32 %v1124_v24  ;;  %v2596_v27 = vmul.f32 -1.442695, %v1124_v24  ;;  %vm1366_vm11 = vcmp.eq.s32.totalorder %v1365_v25, 1 }
0x1420   :  { %3251 = vpow2.f32 %v2596_v27 }
0x1428   :  { %v3250_v26 = vpop.eup %3249 }
0x1429   :  { %1134 = vrot.lane.b32.xlu0 %v3250_v26, %s3333_s19 }
0x142a   :  { %v3252_v28 = vpop.eup %3251 }
0x142b   :  { %v1128_v29 = vadd.f32 1.0, %v3252_v28 }
0x142d   :  { %3253 = vrcp.f32 %v1128_v29 }
0x1437   :  { %v3254_v30 = vpop.eup %3253 }
0x1438   :  { %v1132_v33 = vmul.f32 %v3254_v30, %v1035_v12 }
0x149b   :  { %v1135_v31 = vpop.permute.xlu0 %1134 }
0x149c   :  { %v1137_v32 = vmul.f32 %v3254_v30, %v1135_v31 }
0x149e   :  { %1139 = vrot.lane.b32.xlu1 %v1137_v32, %s3333_s19 }
0x1510   :  { %v1140_v58 = vpop.permute.xlu1 %1139 }
0x1511   :  { %v1142_v34 = vadd.f32 %v1140_v58, %v1132_v33 }
0x1513   :  { %3255 = vtanh.f32 %v1142_v34 }
0x151d   :  { %v3256_v35 = vpop.eup %3255 }
0x151e   :  { %1145 = vrot.lane.b32.xlu0 %v3256_v35, %s3333_s19 }
0x1590   :  { %v1146_v37 = vpop.permute.xlu0 %1145 }
0x1591   :  { %v1148_v38 = vmul.f32 %v3254_v30, %v1146_v37  ;;  %v250_v30 = vadd.f32 %v3484_v16, %v3627_v0 }
0x1593   :  { %v3707_v39 = vsel %vm1152_vm9, %v1148_v38, %v1046_v20  ;;  %1157 = vrot.lane.b32.xlu1 %v1148_v38, %s3334_s7 }
0x1605   :  { %v1158_v40 = vpop.permute.xlu1 %1157 }
0x1606   :  { %2890 = vmatmul.mubr.msk.f32.vlgmr.msra.gmra.mrb[20].mxu0 %vm84_vm0, %v1158_v40 }
0x1607   :  { %3113 = vmatpush3.bf16.msra.mxu0 %v3447_v9  ;;  %2911 = vmatprep.mubr.msk.f32.mxu0 %vm3331_vm1, %v3332_v4 }
0x1608   :  { %3114 = vmatprep.subr.bf16.mxu0 %v3330_v2 }
0x160b   :  { %3116 = vmatpush3.bf16.msra.mxu0 %v3460_v14 }
0x160c   :  { %3123 = vmatprep.subr.bf16.mxu0 %v3330_v2 }
0x16d9   :  { %v1227_v42 = vpop.f32.mrb[20].mxu0 }
0x16da   :  { %v1231_v43 = vadd.f32 %v1227_v42, %v240_v41  ;;  %v2891_v44 = vpop.f32.mrb[21].mxu0 }
0x16dc   :  { %3257 = vtanh.f32 %v1231_v43  ;;  %v2598_v46 = vmul.f32 -1.442695, %v1231_v43  ;;  %v1472_v43 = vstv %s1471_s21  ;;  %s2613_s21 = sshll.u32 %s3513_s27, 3 }
0x16dd   :  { %vm3760_vm12 = vcmp.eq.s32.totalorder %v1472_v43, 1  ;;  %s2011_s24 = scalar_lea.vmem %s4014_s2, %s2613_s21 }
0x16de   :  { %3259 = vpow2.f32 %v2598_v46 }
0x16e6   :  { %v3258_v45 = vpop.eup %3257 }
0x16e7   :  { %1241 = vrot.lane.b32.xlu0 %v3258_v45, %s3333_s19 }
0x16e8   :  { %v3260_v47 = vpop.eup %3259 }
0x16e9   :  { %v1235_v48 = vadd.f32 1.0, %v3260_v47 }
0x16eb   :  { %3261 = vrcp.f32 %v1235_v48 }
0x16f5   :  { %v3262_v49 = vpop.eup %3261 }
0x16f6   :  { %v1239_v52 = vmul.f32 %v3262_v49, %v1142_v34 }
0x1759   :  { %v1242_v50 = vpop.permute.xlu0 %1241 }
0x175a   :  { %v1244_v51 = vmul.f32 %v3262_v49, %v1242_v50 }
0x175c   :  { %1246 = vrot.lane.b32.xlu1 %v1244_v51, %s3333_s19 }
0x17ce   :  { %v1247_v62 = vpop.permute.xlu1 %1246 }
0x17cf   :  { %v1249_v53 = vadd.f32 %v1247_v62, %v1239_v52 }
0x17d1   :  { %3263 = vtanh.f32 %v1249_v53 }
0x17db   :  { %v3264_v54 = vpop.eup %3263 }
0x17dc   :  { %1252 = vrot.lane.b32.xlu0 %v3264_v54, %s3333_s19 }
0x184e   :  { %v1253_v56 = vpop.permute.xlu0 %1252 }
0x184f   :  { %v1255_v6 = vmul.f32 %v3262_v49, %v1253_v56  ;;  %v255_v49 = vadd.f32 %v3625_v63, %v3484_v16 }
0x1851   :  { %v1260_v7 = vsel %vm3723_vm10, %v1255_v6, %v3707_v39  ;;  %1264 = vrot.lane.b32.xlu1 %v1255_v6, %s3334_s7 }
0x18c3   :  { %v1265_v8 = vpop.permute.xlu1 %1264 }
0x18c4   :  { %2901 = vmatmul.mubr.msk.f32.vlgmr.msra.gmra.mrb[12].mxu1 %vm84_vm0, %v1265_v8 }
0x18c5   :  { %3119 = vmatpush3.bf16.msra.mxu1 %v3447_v9  ;;  %2922 = vmatprep.mubr.msk.f32.mxu1 %vm3331_vm1, %v3332_v4 }
0x18c6   :  { %3120 = vmatprep.subr.bf16.mxu1 %v3330_v2 }
0x18c9   :  { %3122 = vmatpush3.bf16.msra.mxu1 %v3460_v14 }
0x18ca   :  { %3129 = vmatprep.subr.bf16.mxu1 %v3330_v2 }
0x1997   :  { %v1334_v11 = vpop.f32.mrb[12].mxu1 }
0x1998   :  { %v1338_v60 = vadd.f32 %v1334_v11, %v245_v10  ;;  %v2902_v12 = vpop.f32.mrb[13].mxu1  ;;  %v1579_v11 = vstv %s1578_s22 }
0x1999   :  { %vm1580_vm13 = vcmp.eq.s32.totalorder %v1579_v11, 1 }
0x199a   :  { %3265 = vtanh.f32 %v1338_v60  ;;  %v2600_v15 = vmul.f32 -1.442695, %v1338_v60 }
0x199c   :  { %3267 = vpow2.f32 %v2600_v15 }
0x19a4   :  { %v3266_v13 = vpop.eup %3265 }
0x19a5   :  { %1348 = vrot.lane.b32.xlu0 %v3266_v13, %s3333_s19 }
0x19a6   :  { %v3268_v17 = vpop.eup %3267 }
0x19a7   :  { %v1342_v18 = vadd.f32 1.0, %v3268_v17  ;;  %v260_v17 = vadd.f32 %v3484_v16, %v3631_v59 }
0x19a9   :  { %3269 = vrcp.f32 %v1342_v18 }
0x19b3   :  { %v3270_v19 = vpop.eup %3269 }
0x19b4   :  { %v1346_v22 = vmul.f32 %v3270_v19, %v1249_v53 }
0x1a17   :  { %v1349_v20 = vpop.permute.xlu0 %1348 }
0x1a18   :  { %v1351_v21 = vmul.f32 %v3270_v19, %v1349_v20 }
0x1a1a   :  { %1353 = vrot.lane.b32.xlu1 %v1351_v21, %s3333_s19 }
0x1a8c   :  { %v1354_v61 = vpop.permute.xlu1 %1353 }
0x1a8d   :  { %v1356_v23 = vadd.f32 %v1354_v61, %v1346_v22 }
0x1a8f   :  { %3271 = vtanh.f32 %v1356_v23 }
0x1a99   :  { %v3272_v24 = vpop.eup %3271 }
0x1a9a   :  { %1359 = vrot.lane.b32.xlu0 %v3272_v24, %s3333_s19 }
0x1b0c   :  { %v1360_v26 = vpop.permute.xlu0 %1359 }
0x1b0d   :  { %v1362_v27 = vmul.f32 %v3270_v19, %v1360_v26 }
0x1b0f   :  { %v3744_v28 = vsel %vm1366_vm11, %v1362_v27, %v1260_v7  ;;  %1371 = vrot.lane.b32.xlu1 %v1362_v27, %s3334_s7 }
0x1b81   :  { %v1372_v29 = vpop.permute.xlu1 %1371 }
0x1b82   :  { %2912 = vmatmul.mubr.msk.f32.vlgmr.msra.gmra.mrb[22].mxu0 %vm84_vm0, %v1372_v29  ;;  %v1686_v29 = vstv %s1685_s23 }
0x1b83   :  { %3125 = vmatpush3.bf16.msra.mxu0 %v3447_v9  ;;  %2933 = vmatprep.mubr.msk.f32.mxu0 %vm3331_vm1, %v3332_v4  ;;  %vm3797_vm14 = vcmp.eq.s32.totalorder %v1686_v29, 1 }
0x1b84   :  { %3126 = vmatprep.subr.bf16.mxu0 %v3330_v2 }
0x1b87   :  { %3128 = vmatpush3.bf16.msra.mxu0 %v3460_v14 }
0x1b88   :  { %3135 = vmatprep.subr.bf16.mxu0 %v3330_v2 }
0x1c55   :  { %v1441_v31 = vpop.f32.mrb[22].mxu0 }
0x1c56   :  { %v1445_v32 = vadd.f32 %v1441_v31, %v250_v30  ;;  %v2913_v33 = vpop.f32.mrb[23].mxu0 }
0x1c58   :  { %3273 = vtanh.f32 %v1445_v32  ;;  %v2602_v34 = vmul.f32 -1.442695, %v1445_v32 }
0x1c5a   :  { %3275 = vpow2.f32 %v2602_v34  ;;  %v3815_v34 = vld [vmem:[%s4015_s6] ss:$0 sm:$0xff]  ;;  %s1792_s6 = scalar_select %p1791_p13, 1, 0 }
0x1c62   :  { %v3274_v58 = vpop.eup %3273 }
0x1c63   :  { %1455 = vrot.lane.b32.xlu0 %v3274_v58, %s3333_s19 }
0x1c64   :  { %v3276_v35 = vpop.eup %3275 }
0x1c65   :  { %v1449_v36 = vadd.f32 1.0, %v3276_v35  ;;  %v265_v35 = vadd.f32 %v3815_v34, %v3629_v1 }
0x1c67   :  { %3277 = vrcp.f32 %v1449_v36 }
0x1c71   :  { %v3278_v37 = vpop.eup %3277 }
0x1c72   :  { %v1453_v40 = vmul.f32 %v3278_v37, %v1356_v23 }
0x1cd5   :  { %v1456_v38 = vpop.permute.xlu0 %1455 }
0x1cd6   :  { %v1458_v39 = vmul.f32 %v3278_v37, %v1456_v38 }
0x1cd8   :  { %1460 = vrot.lane.b32.xlu1 %v1458_v39, %s3333_s19 }
0x1d4a   :  { %v1461_v0 = vpop.permute.xlu1 %1460 }
0x1d4b   :  { %v1463_v41 = vadd.f32 %v1461_v0, %v1453_v40 }
0x1d4d   :  { %3279 = vtanh.f32 %v1463_v41 }
0x1d57   :  { %v3280_v42 = vpop.eup %3279 }
0x1d58   :  { %1466 = vrot.lane.b32.xlu0 %v3280_v42, %s3333_s19 }
0x1dca   :  { %v1467_v44 = vpop.permute.xlu0 %1466 }
0x1dcb   :  { %v1469_v46 = vmul.f32 %v3278_v37, %v1467_v44 }
0x1dcd   :  { %v1474_v47 = vsel %vm3760_vm12, %v1469_v46, %v3744_v28  ;;  %1478 = vrot.lane.b32.xlu1 %v1469_v46, %s3334_s7  ;;  %v1793_v46 = vstv %s1792_s6 }
0x1dce   :  { %vm1794_vm15 = vcmp.eq.s32.totalorder %v1793_v46, 1  ;;  %v2138_v46 = vld [vmem:[%s4022_s10 + $0x28] sm:$0xff] }
0x1e3f   :  { %v1479_v48 = vpop.permute.xlu1 %1478 }
0x1e40   :  { %2923 = vmatmul.mubr.msk.f32.vlgmr.msra.gmra.mrb[14].mxu1 %vm84_vm0, %v1479_v48 }
0x1e41   :  { %3131 = vmatpush3.bf16.msra.mxu1 %v3447_v9  ;;  %2944 = vmatprep.mubr.msk.f32.mxu1 %vm3331_vm1, %v3332_v4 }
0x1e42   :  { %3132 = vmatprep.subr.bf16.mxu1 %v3330_v2 }
0x1e45   :  { %3134 = vmatpush3.bf16.msra.mxu1 %v3460_v14 }
0x1e46   :  { %3141 = vmatprep.subr.bf16.mxu1 %v3330_v2 }
0x1f13   :  { %v1548_v50 = vpop.f32.mrb[14].mxu1 }
0x1f14   :  { %v1552_v51 = vadd.f32 %v1548_v50, %v255_v49  ;;  %v2924_v52 = vpop.f32.mrb[15].mxu1 }
0x1f16   :  { %3281 = vtanh.f32 %v1552_v51  ;;  %v2604_v53 = vmul.f32 -1.442695, %v1552_v51  ;;  %v270_v51 = vadd.f32 %v3815_v34, %v3635_v5  ;;  %v2013_v5 = vld [vmem:[%s4017_s8] sm:$0xff] }
0x1f18   :  { %3283 = vpow2.f32 %v2604_v53 }
0x1f20   :  { %v3282_v62 = vpop.eup %3281 }
0x1f21   :  { %1562 = vrot.lane.b32.xlu0 %v3282_v62, %s3333_s19 }
0x1f22   :  { %v3284_v54 = vpop.eup %3283 }
0x1f23   :  { %v1556_v55 = vadd.f32 1.0, %v3284_v54 }
0x1f25   :  { %3285 = vrcp.f32 %v1556_v55 }
0x1f2f   :  { %v3286_v56 = vpop.eup %3285 }
0x1f30   :  { %v1560_v7 = vmul.f32 %v3286_v56, %v1463_v41 }
0x1f93   :  { %v1563_v57 = vpop.permute.xlu0 %1562 }
0x1f94   :  { %v1565_v6 = vmul.f32 %v3286_v56, %v1563_v57 }
0x1f96   :  { %1567 = vrot.lane.b32.xlu1 %v1565_v6, %s3333_s19 }
0x2008   :  { %v1568_v63 = vpop.permute.xlu1 %1567 }
0x2009   :  { %v1570_v8 = vadd.f32 %v1568_v63, %v1560_v7 }
0x200b   :  { %3287 = vtanh.f32 %v1570_v8 }
0x2015   :  { %v3288_v10 = vpop.eup %3287 }
0x2016   :  { %1573 = vrot.lane.b32.xlu0 %v3288_v10, %s3333_s19  ;;  %v2015_v10 = vld [vmem:[%s4017_s8 + $0x10] sm:$0xff] }
0x2088   :  { %v1574_v60 = vpop.permute.xlu0 %1573 }
0x2089   :  { %v1576_v12 = vmul.f32 %v3286_v56, %v1574_v60  ;;  %v2016_v60 = vld [vmem:[%s4017_s8 + $0x18] sm:$0xff] }
0x208b   :  { %v3781_v13 = vsel %vm1580_vm13, %v1576_v12, %v1474_v47  ;;  %1585 = vrot.lane.b32.xlu1 %v1576_v12, %s3334_s7  ;;  %v3151_v12 = vpack.c.bf16 %v2016_v60, %v2015_v10  ;;  %v2145_v10 = vld [vmem:[%s4022_s10 + $0x60] sm:$0xf] }
0x20fd   :  { %v1586_v15 = vpop.permute.xlu1 %1585 }
0x20fe   :  { %2934 = vmatmul.mubr.msk.f32.vlgmr.msra.gmra.mrb[24].mxu0 %vm84_vm0, %v1586_v15 }
0x20ff   :  { %3137 = vmatpush3.bf16.msra.mxu0 %v3447_v9  ;;  %2955 = vmatprep.mubr.msk.f32.mxu0 %vm3331_vm1, %v3332_v4 }
0x2100   :  { %3138 = vmatprep.subr.bf16.mxu0 %v3330_v2 }
0x2103   :  { %3140 = vmatpush3.bf16.msra.mxu0 %v3460_v14 }
0x2104   :  { %3147 = vmatprep.subr.bf16.mxu0 %v3330_v2 }
0x21d1   :  { %v1655_v18 = vpop.f32.mrb[24].mxu0 }
0x21d2   :  { %v1659_v19 = vadd.f32 %v1655_v18, %v260_v17  ;;  %v2935_v20 = vpop.f32.mrb[25].mxu0 }
0x21d3   :  { %v2614_v20 = vld [vmem:[%s4018_s9] ss:$0 sm:$0xff] }
0x21d4   :  { %3289 = vtanh.f32 %v1659_v19  ;;  %v2606_v22 = vmul.f32 -1.442695, %v1659_v19 }
0x21d6   :  { %3291 = vpow2.f32 %v2606_v22 }
0x21de   :  { %v3290_v21 = vpop.eup %3289 }
0x21df   :  { %1669 = vrot.lane.b32.xlu0 %v3290_v21, %s3333_s19 }
0x21e0   :  { %v3292_v61 = vpop.eup %3291 }
0x21e1   :  { %v1663_v23 = vadd.f32 1.0, %v3292_v61 }
0x21e3   :  { %3293 = vrcp.f32 %v1663_v23 }
0x21ed   :  { %v3294_v24 = vpop.eup %3293 }
0x21ee   :  { %v1667_v27 = vmul.f32 %v3294_v24, %v1570_v8  ;;  %v2014_v8 = vld [vmem:[%s4017_s8 + $0x8] sm:$0xff] }
0x21ef   :  { %v3148_v11 = vpack.c.bf16 %v2014_v8, %v2013_v5 }
0x2251   :  { %v1670_v25 = vpop.permute.xlu0 %1669 }
0x2252   :  { %v1672_v26 = vmul.f32 %v3294_v24, %v1670_v25 }
0x2254   :  { %1674 = vrot.lane.b32.xlu1 %v1672_v26, %s3333_s19 }
0x22c6   :  { %v1675_v16 = vpop.permute.xlu1 %1674 }
0x22c7   :  { %v1677_v59 = vadd.f32 %v1675_v16, %v1667_v27 }
0x22c9   :  { %3295 = vtanh.f32 %v1677_v59 }
0x22d3   :  { %v3296_v28 = vpop.eup %3295 }
0x22d4   :  { %1680 = vrot.lane.b32.xlu0 %v3296_v28, %s3333_s19 }
0x2346   :  { %v1681_v30 = vpop.permute.xlu0 %1680 }
0x2347   :  { %v1683_v32 = vmul.f32 %v3294_v24, %v1681_v30  ;;  %v1900_v24 = vstv %s1899_s25 }
0x2348   :  { %vm3863_vm2 = vcmp.eq.s32.totalorder %v1900_v24, 1 }
0x2349   :  { %v1688_v33 = vsel %vm3797_vm14, %v1683_v32, %v3781_v13  ;;  %1692 = vrot.lane.b32.xlu1 %v1683_v32, %s3334_s7  ;;  %v2012_v13 = vld [vmem:[%s2011_s24] sm:$0xff] }
0x23bb   :  { %v1693_v58 = vpop.permute.xlu1 %1692 }
0x23bc   :  { %2945 = vmatmul.mubr.msk.f32.vlgmr.msra.gmra.mrb[16].mxu1 %vm84_vm0, %v1693_v58  ;;  %v2121_v58 = vstv %s3513_s27 }
0x23bd   :  { %3143 = vmatpush3.bf16.msra.mxu1 %v3447_v9  ;;  %2966 = vmatprep.mubr.msk.f32.mxu1 %vm3331_vm1, %v3332_v4 }
0x23be   :  { %3144 = vmatprep.subr.bf16.mxu1 %v3330_v2 }
0x23c1   :  { %3146 = vmatpush3.bf16.msra.mxu1 %v3460_v14 }
0x23c2   :  { %2980 = vmatprep.subr.mxu1 %v3332_v4 }
0x248f   :  { %v1762_v36 = vpop.f32.mrb[16].mxu1 }
0x2490   :  { %v1766_v37 = vadd.f32 %v1762_v36, %v265_v35  ;;  %v2946_v9 = vpop.f32.mrb[17].mxu1  ;;  %v3335_v35 = vmov 0   ;;  %v296_v36 = vld [vmem:[%s4019_s1] sm:$0xff] }
0x2491   :  { %3192 = vset.pattern.permute.xlu0 %v3335_v35  ;;  %vm2122_vm3 = vcmp.gt.s32.totalorder %v296_v36, %v2121_v58  ;;  %v275_v9 = vadd.f32 %v3815_v34, %v3633_v3  ;;  %v2134_v3 = vld [vmem:[%s4022_s10 + $0x8] sm:$0xff]  ;;  %v2135_v34 = vld [vmem:[%s4022_s10 + $0x10] sm:$0xff] }
0x2492   :  { %3297 = vtanh.f32 %v1766_v37  ;;  %v2608_v39 = vmul.f32 -1.442695, %v1766_v37  ;;  %v2617_v37 = vsel %vm2122_vm3, 1.0, %v3332_v4 }
0x2494   :  { %3299 = vpow2.f32 %v2608_v39 }
0x249c   :  { %v3298_v38 = vpop.eup %3297 }
0x249d   :  { %1776 = vrot.lane.b32.xlu0 %v3298_v38, %s3333_s19 }
0x249e   :  { %v3300_v14 = vpop.eup %3299 }
0x249f   :  { %v1770_v40 = vadd.f32 1.0, %v3300_v14 }
0x24a1   :  { %3301 = vrcp.f32 %v1770_v40  ;;  %v2147_v40 = vld [vmem:[%s4020_s11] sm:$0xf] }
0x24ab   :  { %v3302_v0 = vpop.eup %3301 }
0x24ac   :  { %v1774_v43 = vmul.f32 %v3302_v0, %v1677_v59 }
0x250f   :  { %v1777_v41 = vpop.permute.xlu0 %1776 }
0x2510   :  { %v1779_v42 = vmul.f32 %v3302_v0, %v1777_v41  ;;  %v2133_v41 = vld [vmem:[%s4022_s10] sm:$0xff] }
0x2512   :  { %1781 = vrot.lane.b32.xlu1 %v1779_v42, %s3333_s19  ;;  %v2136_v42 = vld [vmem:[%s4022_s10 + $0x18] sm:$0xff] }
0x2584   :  { %v1782_v1 = vpop.permute.xlu1 %1781 }
0x2585   :  { %v1784_v44 = vadd.f32 %v1782_v1, %v1774_v43  ;;  %v3154_v43 = vpack.c.bf16 %v2134_v3, %v2133_v41  ;;  %v3157_v1 = vpack.c.bf16 %v2136_v42, %v2135_v34 }
0x2587   :  { %3303 = vtanh.f32 %v1784_v44 }
0x2591   :  { %v3304_v45 = vpop.eup %3303 }
0x2592   :  { %1787 = vrot.lane.b32.xlu0 %v3304_v45, %s3333_s19  ;;  %v2137_v45 = vld [vmem:[%s4022_s10 + $0x20] sm:$0xff] }
0x2604   :  { %v1788_v47 = vpop.permute.xlu0 %1787 }
0x2605   :  { %v1790_v48 = vmul.f32 %v3302_v0, %v1788_v47  ;;  %v2146_v0 = vld [vmem:[%s4021_s4] sm:$0xff]  ;;  %v3160_v47 = vpack.c.bf16 %v2138_v46, %v2137_v45 }
0x2607   :  { %v3823_v49 = vsel %vm1794_vm15, %v1790_v48, %v1688_v33  ;;  %1799 = vrot.lane.b32.xlu1 %v1790_v48, %s3334_s7  ;;  %v2139_v48 = vld [vmem:[%s4022_s10 + $0x30] sm:$0xff] }
0x2679   :  { %v1800_v50 = vpop.permute.xlu1 %1799 }
0x267a   :  { %2956 = vmatmul.mubr.msk.f32.vlgmr.msra.gmra.mrb[26].mxu0 %vm84_vm0, %v1800_v50  ;;  %v2140_v50 = vld [vmem:[%s4022_s10 + $0x38] sm:$0xff] }
0x267b   :  { %2977 = vmatprep.mubr.msk.f32.mxu0 %vm3331_vm1, %v3332_v4  ;;  %3149 = vmatpush3.bf16.msra.mxu0 %v3148_v11  ;;  %v2132_v11 = vld [vmem:[%s4023_s3] sm:$0xff] }
0x267c   :  { %3150 = vmatprep.subr.bf16.mxu0 %v3330_v2 }
0x267f   :  { %3152 = vmatpush3.bf16.msra.mxu0 %v3151_v12 }
0x2680   :  { %3171 = vmatprep.subr.bf16.mxu0 %v3330_v2 }
0x2682   :  { %2978 = vmatmul.mubr.msk.f32.vlgmr.msra.gmra.mrb[28].mxu0 %vm84_vm0, %v2012_v13 }
0x2683   :  { %3022 = vmatprep.mubr.msk.f32.mxu0 %vm3331_vm1, %v3332_v4 }
0x274d   :  { %v1869_v52 = vpop.f32.mrb[26].mxu0 }
0x274e   :  { %v1873_v62 = vadd.f32 %v1869_v52, %v270_v51  ;;  %v2957_v53 = vpop.f32.mrb[27].mxu0  ;;  %v3163_v51 = vpack.c.bf16 %v2140_v50, %v2139_v48 }
0x2750   :  { %3305 = vtanh.f32 %v1873_v62  ;;  %v2610_v55 = vmul.f32 -1.442695, %v1873_v62 }
0x2752   :  { %3307 = vpow2.f32 %v2610_v55  ;;  %v2142_v55 = vld [vmem:[%s4022_s10 + $0x48] sm:$0xff] }
0x2755   :  { %v2093_v21 = vpop.f32.mrb[28].mxu0 }
0x2756   :  { %v2094_v22 = vadd.f32 %v2614_v20, %v2093_v21  ;;  %v2979_v61 = vpop.f32.mrb[29].mxu0  ;;  %v2319_v21 = vld [vmem:[%s4024_s14 + $0x18] sm:$0xff] }
0x2758   :  { %v2616_v59 = vmul.f32 -1.442695, %v2094_v22 }
0x275a   :  { %v3306_v54 = vpop.eup %3305 }
0x275b   :  { %1883 = vrot.lane.b32.xlu0 %v3306_v54, %s3333_s19  ;;  %v2141_v54 = vld [vmem:[%s4022_s10 + $0x40] sm:$0xff] }
0x275c   :  { %v3308_v56 = vpop.eup %3307 }
0x275d   :  { %v1877_v57 = vadd.f32 1.0, %v3308_v56 }
0x275f   :  { %3309 = vrcp.f32 %v1877_v57  ;;  %v3166_v57 = vpack.c.bf16 %v2142_v55, %v2141_v54 }
0x2769   :  { %v3310_v6 = vpop.eup %3309 }
0x276a   :  { %v1881_v15 = vmul.f32 %v3310_v6, %v1784_v44 }
0x27cd   :  { %v1884_v7 = vpop.permute.xlu0 %1883 }
0x27ce   :  { %v1886_v63 = vmul.f32 %v3310_v6, %v1884_v7  ;;  %v2143_v7 = vld [vmem:[%s4022_s10 + $0x50] sm:$0xff] }
0x27d0   :  { %1888 = vrot.lane.b32.xlu1 %v1886_v63, %s3333_s19  ;;  %v2144_v63 = vld [vmem:[%s4022_s10 + $0x58] sm:$0xff] }
0x27d1   :  { %v3169_v8 = vpack.c.bf16 %v2144_v63, %v2143_v7 }
0x2842   :  { %v1889_v17 = vpop.permute.xlu1 %1888 }
0x2843   :  { %v3854_v18 = vadd.f32 %v1889_v17, %v1881_v15  ;;  %v2316_v15 = vld [vmem:[%s4024_s14] sm:$0xff]  ;;  %v2317_v17 = vld [vmem:[%s4024_s14 + $0x8] sm:$0xff] }
0x2844   :  { %v3172_v20 = vpack.c.bf16 %v2317_v17, %v2316_v15 }
0x2845   :  { %3311 = vtanh.f32 %v3854_v18 }
0x2846   :  { %3313 = vtanh.f32 %v2094_v22  ;;  %3173 = vmatpush3.bf16.msra.mxu0 %v3172_v20 }
0x2847   :  { %3315 = vpow2.f32 %v2616_v59  ;;  %3174 = vmatprep.subr.bf16.mxu0 %v3330_v2 }
0x284f   :  { %v3312_v19 = vpop.eup %3311 }
0x2850   :  { %1894 = vrot.lane.b32.xlu0 %v3312_v19, %s3333_s19  ;;  %v3314_v23 = vpop.eup %3313  ;;  %v2318_v19 = vld [vmem:[%s4024_s14 + $0x10] sm:$0xff] }
0x2851   :  { %v3316_v28 = vpop.eup %3315  ;;  %v3175_v61 = vpack.c.bf16 %v2319_v21, %v2318_v19 }
0x2852   :  { %v2100_v29 = vadd.f32 1.0, %v3316_v28 }
0x2853   :  { %3176 = vmatpush3.bf16.msra.mxu0 %v3175_v61 }
0x2854   :  { %2106 = vrot.lane.b32.xlu0 %v3314_v23, %s3333_s19  ;;  %3317 = vrcp.f32 %v2100_v29  ;;  %3177 = vmatprep.subr.bf16.mxu0 %v3330_v2 }
0x285e   :  { %v3875_v30 = vpop.eup %3317 }
0x285f   :  { %v2104_v56 = vmul.f32 0.0, %v3875_v30 }
0x28c2   :  { %v1895_v25 = vpop.permute.xlu0 %1894 }
0x28c3   :  { %v3867_v27 = vmul.f32 %v3310_v6, %v1895_v25 }
0x28c5   :  { %v1902_v16 = vsel %vm3863_vm2, %v3867_v27, %v3823_v49  ;;  %1906 = vrot.lane.b32.xlu1 %v3867_v27, %s3334_s7 }
0x28c6   :  { %v2107_v31 = vpop.permute.xlu0 %2106 }
0x28c7   :  { %v2109_v32 = vmul.f32 %v3875_v30, %v2107_v31 }
0x28c9   :  { %2111 = vrot.lane.b32.xlu0 %v2109_v32, %s3333_s19 }
0x28cd   :  { %2127 = vperm.xlu0 %3192, %v2617_v37  }
0x2937   :  { %v1907_v33 = vpop.permute.xlu1 %1906 }
0x2938   :  { %2967 = vmatmul.mubr.msk.f32.vlgmr.msra.gmra.mrb[18].mxu1 %vm84_vm0, %v1907_v33 }
0x2939   :  { %2982 = vmatprep.mubr.msk.f32.mxu1 %vm3331_vm1, %v3332_v4  ;;  %2981 = vmatpush3.msk.msra.mxu1 %vm2152_vm4, %v2147_v40  ;;  %v2007_v40 = vstv %s2006_s29 }
0x293a   :  { %3153 = vmatprep.subr.bf16.mxu1 %v3330_v2  ;;  %vm2008_vm7 = vcmp.eq.s32.totalorder %v2007_v40, 1 }
0x293b   :  { %v2112_v6 = vpop.permute.xlu0 %2111 }
0x293c   :  { %2983 = vmatmul.mubr.msk.f32.vlgmr.msra.gmra.mrb[20].mxu1 %vm2148_vm5, %v2146_v0  ;;  %v2114_v5 = vadd.f32 %v2112_v6, %v2104_v56 }
0x293d   :  { %3011 = vmatprep.mubr.msk.f32.mxu1 %vm3331_vm1, %v3332_v4  ;;  %3155 = vmatpush3.bf16.msra.mxu1 %v3154_v43  ;;  %v2470_v43 = vld [vmem:[%s4026_s15] sm:$0xff] }
0x293e   :  { %3156 = vmatprep.subr.bf16.mxu1 %v3330_v2 }
0x2941   :  { %3158 = vmatpush3.bf16.msra.mxu1 %v3157_v1  ;;  %v2471_v1 = vld [vmem:[%s4026_s15 + $0x8] sm:$0xff] }
0x2942   :  { %3159 = vmatprep.subr.bf16.mxu1 %v3330_v2  ;;  %v3184_v26 = vpack.c.bf16 %v2471_v1, %v2470_v43 }
0x2945   :  { %3161 = vmatpush3.bf16.msra.mxu1 %v3160_v47 }
0x2946   :  { %3162 = vmatprep.subr.bf16.mxu1 %v3330_v2 }
0x2949   :  { %3164 = vmatpush3.bf16.msra.mxu1 %v3163_v51  ;;  %v2626_v51 = vld [vmem:[%s4028_s16] ss:$0 sm:$0xff] }
0x294a   :  { %3165 = vmatprep.subr.bf16.mxu1 %v3330_v2 }
0x294c   :  { %v2128_v28 = vpop.permute.xlu0 %2127 }
0x294d   :  { %3167 = vmatpush3.bf16.msra.mxu1 %v3166_v57 }
0x294e   :  { %3168 = vmatprep.subr.bf16.mxu1 %v3330_v2 }
0x2951   :  { %3170 = vmatpush3.bf16.msra.mxu1 %v3169_v8 }
0x2952   :  { %3009 = vmatprep.subr.mxu1 %v3332_v4 }
0x2955   :  { %3010 = vmatpush3.msk.msra.mxu1 %vm2152_vm4, %v2145_v10 }
0x2956   :  { %3012 = vmatmul.mubr.msk.f32.vlgmr.msra.gmra.mrb[22].mxu1 %vm2226_vm6, %v2132_v11 }
0x2a0b   :  { %v1976_v38 = vpop.f32.mrb[18].mxu1 }
0x2a0c   :  { %v1980_v39 = vadd.f32 %v1976_v38, %v275_v9  ;;  %v2968_v14 = vpop.f32.mrb[19].mxu1  ;;  %v2314_v38 = vld [vmem:[%s4025_s13 + $0x10] sm:$0xff] }
0x2a0e   :  { %3319 = vtanh.f32 %v1980_v39  ;;  %v2612_v52 = vmul.f32 -1.442695, %v1980_v39  ;;  %v2315_v39 = vld [vmem:[%s4025_s13 + $0x18] sm:$0xff] }
0x2a0f   :  { %v2222_v31 = vpop.f32.mrb[20].mxu1  ;;  %v3181_v0 = vpack.c.bf16 %v2315_v39, %v2314_v38 }
0x2a10   :  { %3321 = vpow2.f32 %v2612_v52  ;;  %v2984_v33 = vpop.f32.mrb[21].mxu1 }
0x2a18   :  { %v3320_v44 = vpop.eup %3319 }
0x2a19   :  { %1990 = vrot.lane.b32.xlu1 %v3320_v44, %s3333_s19 }
0x2a1a   :  { %v3322_v62 = vpop.eup %3321 }
0x2a1b   :  { %v1984_v53 = vadd.f32 1.0, %v3322_v62 }
0x2a1d   :  { %3323 = vrcp.f32 %v1984_v53 }
0x2a1e   :  { %3325 = vtanh.f32 %v2114_v5 }
0x2a27   :  { %v3324_v60 = vpop.eup %3323 }
0x2a28   :  { %v3326_v22 = vpop.eup %3325  ;;  %v1988_v23 = vmul.f32 %v3324_v60, %v3854_v18  ;;  %v2312_v18 = vld [vmem:[%s4025_s13] sm:$0xff] }
0x2a29   :  { %v2299_v35 = vpop.f32.mrb[22].mxu1 }
0x2a2a   :  { %v2300_v36 = vadd.f32 %v2299_v35, %v2222_v31  ;;  %v3013_v37 = vpop.f32.mrb[23].mxu1 }
0x2a8b   :  { %v1991_v12 = vpop.permute.xlu1 %1990 }
0x2a8c   :  { %v1993_v13 = vmul.f32 %v3324_v60, %v1991_v12 }
0x2a8e   :  { %1995 = vrot.lane.b32.xlu1 %v1993_v13, %s3333_s19 }
0x2a92   :  { %2117 = vrot.lane.b32.xlu1 %v3326_v22, %s3333_s19 }
0x2b00   :  { %v1996_v24 = vpop.permute.xlu1 %1995 }
0x2b01   :  { %v1998_v25 = vadd.f32 %v1996_v24, %v1988_v23 }
0x2b03   :  { %3327 = vtanh.f32 %v1998_v25 }
0x2b04   :  { %v2118_v59 = vpop.permute.xlu1 %2117 }
0x2b05   :  { %v2120_v29 = vmul.f32 %v3875_v30, %v2118_v59  ;;  %v2313_v30 = vld [vmem:[%s4025_s13 + $0x8] sm:$0xff] }
0x2b06   :  { %v3178_v9 = vpack.c.bf16 %v2313_v30, %v2312_v18 }
0x2b07   :  { %v2131_v32 = vmul.f32 %v2128_v28, %v2120_v29 }
0x2b09   :  { %2321 = vrot.lane.b32.xlu0 %v2131_v32, %s3334_s7 }
0x2b0d   :  { %v3328_v58 = vpop.eup %3327 }
0x2b0e   :  { %2001 = vrot.lane.b32.xlu1 %v3328_v58, %s3333_s19 }
0x2b7b   :  { %v2322_v14 = vpop.permute.xlu0 %2321 }
0x2b7c   :  { %3023 = vmatmul.mubr.msk.f32.vlgmr.msra.gmra.mrb[30].mxu0 %vm84_vm0, %v2322_v14 }
0x2b7d   :  { %3179 = vmatpush3.bf16.msra.mxu0 %v3178_v9  ;;  %3033 = vmatprep.mubr.msk.f32.mxu0 %vm3331_vm1, %v3332_v4 }
0x2b7e   :  { %3180 = vmatprep.subr.bf16.mxu0 %v3330_v2 }
0x2b80   :  { %v2002_v41 = vpop.permute.xlu1 %2001 }
0x2b81   :  { %v2004_v3 = vmul.f32 %v3324_v60, %v2002_v41  ;;  %3182 = vmatpush3.bf16.msra.mxu0 %v3181_v0 }
0x2b82   :  { %3183 = vmatprep.subr.bf16.mxu0 %v3330_v2  ;;  %v2622_v2 = vld [vmem:[%s4027_s12] ss:$0 sm:$0xff] }
0x2b83   :  { %v2009_v34 = vsel %vm2008_vm7, %v2004_v3, %v1902_v16  ;;  %v2310_v44 = vadd.f32 %v2622_v2, %v2300_v36 }
0x2b84   :  { %v2130_v42 = vmul.f32 %v2128_v28, %v2009_v34 }
0x2b85   :  { %v2311_v49 = vmax.f32 %v2310_v44, 0.0 }
0x2b86   :  { %2396 = vrot.lane.b32.xlu1 %v2130_v42, %s3334_s7 }
0x2bf8   :  { %v2397_v45 = vpop.permute.xlu1 %2396 }
0x2bf9   :  { %3034 = vmatmul.mubr.msk.f32.vlgmr.msra.gmra.mrb[32].mxu0 %vm84_vm0, %v2397_v45  ;;  %vm2556_vm0 = vcmask 523264  }
0x2bfa   :  { %3185 = vmatpush3.bf16.msra.mxu0 %v3184_v26  ;;  %3040 = vmatprep.mubr.msk.f32.mxu0 %vm3331_vm1, %v3332_v4 }
0x2bfd   :  { %3041 = vmatmul.mubr.msk.f32.vlgmr.msra.gmra.mrb[34].mxu0 %vm2472_vm8, %v2311_v49 }
0x2c4f   :  { %v2391_v27 = vpop.f32.mrb[30].mxu0 }
0x2c50   :  { %v3024_v16 = vpop.f32.mrb[31].mxu0 }
0x2ccc   :  { %v2466_v46 = vpop.f32.mrb[32].mxu0 }
0x2ccd   :  { %v2467_v47 = vadd.f32 %v2466_v46, %v2391_v27  ;;  %v3035_v48 = vpop.f32.mrb[33].mxu0 }
0x2cd0   :  { %v2542_v50 = vpop.f32.mrb[34].mxu0 }
0x2cd1   :  { %v2546_v52 = vadd.f32 %v2542_v50, %v2467_v47  ;;  %v3042_v62 = vpop.f32.mrb[35].mxu0 }
0x2cd3   :  { %v2554_v53 = vadd.f32 %v2626_v51, %v2546_v52 }
0x2cd5   :  { %v2555_v54 = vmax.f32 %v2554_v53, 0.0 }
0x2cd7   :  { %2557 = vst.msk [vmem:[%s4029_s17] sm:$0xff] %vm2556_vm0, %v2555_v54 }

</bundles_post_ra>
